<compile_context>
chip_gen: v7x
topology: tpu7x:2x2x1
jax: 0.10.0
libtpu: 0.0.40
codegen_flags: <defaults>
</compile_context>

<pallas_src>
import functools

import jax
import jax.numpy as jnp
from jax.experimental import pallas as pl
from jax.experimental.pallas import tpu as pltpu

# ---------------- small synthetic BERT config ----------------
VOCAB = 100
MAX_POS = 16
TYPE_VOCAB = 2
HIDDEN = 32
N_HEADS = 2
HEAD_DIM = HIDDEN // N_HEADS
INTERMEDIATE = 64
N_LAYERS = 2
N_CLASSES = 3
BATCH = 2
SEQ = 8
LN_EPS = 1e-12


# ---------------- fused forward kernel ----------------
def _bert_fused_kernel(
    emb_ref, mask_ref,
    emb_ln_ref,
    wqkv_ref, bqkv_ref, wo_ref, bo_ref, ln1_ref,
    w1_ref, b1_ref, w2_ref, b2_ref, ln2_ref,
    pool_w_ref, pool_b_ref, cls_w_ref, cls_b_ref,
    logits_ref,
    *, batch, seq,
):
    bs = batch * seq

    def mm(x, w_bf16):
        # activations cast to bf16; weights are pre-cast bf16; f32 accumulation.
        return jnp.dot(x.astype(jnp.bfloat16), w_bf16,
                       preferred_element_type=jnp.float32)

    def layer_norm(x, gb):
        # gb: (2, H) -> row 0 = gamma, row 1 = beta.  Stats in f32.
        mean = jnp.mean(x, axis=-1, keepdims=True)
        var = jnp.mean((x - mean) ** 2, axis=-1, keepdims=True)
        return (x - mean) * jax.lax.rsqrt(var + LN_EPS) * gb[0:1, :] + gb[1:2, :]

    # --- embeddings: word+pos+type slab precomputed on host; LN here ---
    h = layer_norm(emb_ref[...], emb_ln_ref[...])                  # (bs, H) f32

    add_mask = mask_ref[...]                                       # (batch, 1, seq)
    scale = 1.0 / (HEAD_DIM ** 0.5)

    # --- encoder layers (statically unrolled; weights stacked over layers) ---
    for l in range(N_LAYERS):
        # fused QKV projection: one (H, 3H) matmul instead of three
        qkv = mm(h, wqkv_ref[l]) + bqkv_ref[l]                     # (bs, 3H) f32

        # attention: batched over batch via einsum; static loop over heads only
        head_ctx = []
        for hh in range(N_HEADS):
            c = hh * HEAD_DIM
            qh = qkv[:, c:c + HEAD_DIM].reshape(batch, seq, HEAD_DIM)
            kh = qkv[:, HIDDEN + c:HIDDEN + c + HEAD_DIM].reshape(batch, seq, HEAD_DIM)
            vh = qkv[:, 2 * HIDDEN + c:2 * HIDDEN + c + HEAD_DIM].reshape(
                batch, seq, HEAD_DIM)

            s = jnp.einsum('bqd,bkd->bqk',
                           qh.astype(jnp.bfloat16), kh.astype(jnp.bfloat16),
                           preferred_element_type=jnp.float32) * scale
            s = s + add_mask                                        # (b,1,s) bcast
            s = s - jnp.max(s, axis=-1, keepdims=True)
            p = jnp.exp(s)
            p = p * pl.reciprocal(jnp.sum(p, axis=-1, keepdims=True), approx=True)

            ctx_h = jnp.einsum('bqk,bkd->bqd',
                               p.astype(jnp.bfloat16), vh.astype(jnp.bfloat16),
                               preferred_element_type=jnp.float32)  # (b,s,hd)
            head_ctx.append(ctx_h.reshape(bs, HEAD_DIM))
        ctx = jnp.concatenate(head_ctx, axis=1)                     # (bs, H), vregs

        # attention output projection + residual + LayerNorm (fused)
        attn_out = mm(ctx, wo_ref[l]) + bo_ref[l]
        h = layer_norm(attn_out + h, ln1_ref[l])

        # feed-forward + residual + LayerNorm (fused)
        ffn = mm(h, w1_ref[l]) + b1_ref[l]
        # TODO(synk): BERT uses exact erf-GELU; tanh approximation used here.
        ffn = 0.5 * ffn * (1.0 + jnp.tanh(
            0.7978845608028654 * (ffn + 0.044715 * ffn * ffn * ffn)))
        ffn = mm(ffn, w2_ref[l]) + b2_ref[l]
        h = layer_norm(ffn + h, ln2_ref[l])

    # --- BERT pooler on [CLS] tokens: static sublane-aligned row slices ---
    cls_tok = jnp.concatenate(
        [h[b * seq:b * seq + 1, :] for b in range(batch)], axis=0)  # (batch, H)
    pooled = jnp.tanh(mm(cls_tok, pool_w_ref[...]) + pool_b_ref[...])

    # --- classifier head (kept f32 for output parity) ---
    logits = jnp.dot(pooled, cls_w_ref[...],
                     preferred_element_type=jnp.float32) + cls_b_ref[...]
    logits_ref[...] = logits.astype(logits_ref.dtype)


# ---------------- parameter init (deterministic, synthetic, pre-packed) ----------------
def init_params(key):
    keys = jax.random.split(key, 64)
    it = iter(keys)

    def nrm(shape):
        return 0.02 * jax.random.normal(next(it), shape, jnp.float32)

    def ln_pair():
        return jnp.stack([jnp.ones((HIDDEN,), jnp.float32),
                          jnp.zeros((HIDDEN,), jnp.float32)])      # (2, H)

    wqkv, bqkv, wo, bo, ln1, w1, b1, w2, b2, ln2 = ([] for _ in range(10))
    for _ in range(N_LAYERS):
        wq, wk, wv = nrm((HIDDEN, HIDDEN)), nrm((HIDDEN, HIDDEN)), nrm((HIDDEN, HIDDEN))
        wqkv.append(jnp.concatenate([wq, wk, wv], axis=1))          # (H, 3H)
        bqkv.append(jnp.zeros((1, 3 * HIDDEN), jnp.float32))
        wo.append(nrm((HIDDEN, HIDDEN)))
        bo.append(jnp.zeros((1, HIDDEN), jnp.float32))
        ln1.append(ln_pair())
        w1.append(nrm((HIDDEN, INTERMEDIATE)))
        b1.append(jnp.zeros((1, INTERMEDIATE), jnp.float32))
        w2.append(nrm((INTERMEDIATE, HIDDEN)))
        b2.append(jnp.zeros((1, HIDDEN), jnp.float32))
        ln2.append(ln_pair())

    params = dict(
        # embedding tables stay f32 (exact gather happens on the host)
        word_emb=nrm((VOCAB, HIDDEN)),
        pos_emb=nrm((MAX_POS, HIDDEN)),
        # only token_type 0 is used (all-zero token_type_ids), matching the original
        type_row=nrm((TYPE_VOCAB, HIDDEN))[0:1, :],
        emb_ln=ln_pair(),
        # weight matrices pre-cast to bf16 ONCE at init (no in-kernel vcvt)
        wqkv=jnp.stack(wqkv).astype(jnp.bfloat16),
        bqkv=jnp.stack(bqkv),
        wo=jnp.stack(wo).astype(jnp.bfloat16),
        bo=jnp.stack(bo),
        ln1=jnp.stack(ln1),
        w1=jnp.stack(w1).astype(jnp.bfloat16),
        b1=jnp.stack(b1),
        w2=jnp.stack(w2).astype(jnp.bfloat16),
        b2=jnp.stack(b2),
        ln2=jnp.stack(ln2),
        pool_w=nrm((HIDDEN, HIDDEN)).astype(jnp.bfloat16),
        pool_b=jnp.zeros((1, HIDDEN), jnp.float32),
        cls_w=nrm((HIDDEN, N_CLASSES)),                            # f32 classifier
        cls_b=jnp.zeros((1, N_CLASSES), jnp.float32),
    )
    return params


# ---------------- forward pass (matches network.forward semantics) ----------------
def network_forward(params, input_ids, attention_mask):
    # torch.squeeze equivalents (explicit axis so batch==1 is safe)
    input_ids = jnp.squeeze(input_ids, axis=1)
    attention_mask = jnp.squeeze(attention_mask, axis=1)
    B, S = input_ids.shape
    bs = B * S

    # Hoisted out of the kernel (per perf review): exact f32 word-embedding
    # gather, static position slab, token-type row, additive attention mask.
    ids_flat = input_ids.reshape(bs).astype(jnp.int32)
    word = jnp.take(params["word_emb"], ids_flat, axis=0)          # (bs, H) f32
    pos = jnp.tile(params["pos_emb"][:S], (B, 1))                  # (bs, H) f32
    emb_in = word + pos + params["type_row"]                       # (bs, H) f32
    add_mask = ((1.0 - attention_mask.astype(jnp.float32)) * -10000.0
                ).reshape(B, 1, S)                                 # (B, 1, S) f32

    vmem = pl.BlockSpec(memory_space=pltpu.MemorySpace.VMEM)
    kernel = functools.partial(_bert_fused_kernel, batch=B, seq=S)
    logits = pl.pallas_call(
        kernel,
        out_shape=jax.ShapeDtypeStruct((B, N_CLASSES), jnp.float32),
        in_specs=[vmem] * 17,
        out_specs=vmem,
    )(emb_in, add_mask,
      params["emb_ln"],
      params["wqkv"], params["bqkv"], params["wo"], params["bo"], params["ln1"],
      params["w1"], params["b1"], params["w2"], params["b2"], params["ln2"],
      params["pool_w"], params["pool_b"], params["cls_w"], params["cls_b"])
    return logits


if __name__ == "__main__":
    key = jax.random.PRNGKey(0)
    pkey, ikey = jax.random.split(key)
    params = init_params(pkey)

    # inputs carry a size-1 dim so the squeeze in forward() is exercised,
    # mirroring the PyTorch module.
    input_ids = jax.random.randint(ikey, (BATCH, 1, SEQ), 0, VOCAB, dtype=jnp.int32)
    attention_mask = jnp.ones((BATCH, 1, SEQ), dtype=jnp.int32)

    fwd = jax.jit(network_forward)
    logits = fwd(params, input_ids, attention_mask)
    jax.block_until_ready(logits)
    assert logits.shape == (BATCH, N_CLASSES)
    print("KERNEL_OK")
</pallas_src>

<mosaic_0001>
module attributes {stable_mosaic.version = 11 : i64} {
  func.func @_bert_fused_kernel(%arg0: memref<16x32xf32, #tpu.memory_space<vmem>>, %arg1: memref<2x1x8xf32, #tpu.memory_space<vmem>>, %arg2: memref<2x32xf32, #tpu.memory_space<vmem>>, %arg3: memref<2x32x96xbf16, #tpu.memory_space<vmem>>, %arg4: memref<2x1x96xf32, #tpu.memory_space<vmem>>, %arg5: memref<2x32x32xbf16, #tpu.memory_space<vmem>>, %arg6: memref<2x1x32xf32, #tpu.memory_space<vmem>>, %arg7: memref<2x2x32xf32, #tpu.memory_space<vmem>>, %arg8: memref<2x32x64xbf16, #tpu.memory_space<vmem>>, %arg9: memref<2x1x64xf32, #tpu.memory_space<vmem>>, %arg10: memref<2x64x32xbf16, #tpu.memory_space<vmem>>, %arg11: memref<2x1x32xf32, #tpu.memory_space<vmem>>, %arg12: memref<2x2x32xf32, #tpu.memory_space<vmem>>, %arg13: memref<32x32xbf16, #tpu.memory_space<vmem>>, %arg14: memref<1x32xf32, #tpu.memory_space<vmem>>, %arg15: memref<32x3xf32, #tpu.memory_space<vmem>>, %arg16: memref<1x3xf32, #tpu.memory_space<vmem>>, %arg17: memref<2x3xf32, #tpu.memory_space<vmem>>) attributes {dimension_semantics = [], scalar_prefetch = 0 : i64, scratch_operands = 0 : i64, tpu.core_type = #tpu.core_type<tc>} {
    %c0 = arith.constant 0 : index
    %c0_0 = arith.constant 0 : index
    %0 = vector.load %arg0[%c0, %c0_0] : memref<16x32xf32, #tpu.memory_space<vmem>>, vector<16x32xf32>
    %c0_1 = arith.constant 0 : index
    %c0_2 = arith.constant 0 : index
    %1 = vector.load %arg2[%c0_1, %c0_2] : memref<2x32xf32, #tpu.memory_space<vmem>>, vector<2x32xf32>
    %cst = arith.constant dense<0.000000e+00> : vector<16xf32>
    %2 = vector.multi_reduction <add>, %0, %cst [1] : vector<16x32xf32> to vector<16xf32>
    %3 = vector.shape_cast %2 : vector<16xf32> to vector<16x1xf32>
    %cst_3 = arith.constant 3.200000e+01 : f32
    %4 = vector.broadcast %cst_3 : f32 to vector<16x1xf32>
    %5 = arith.divf %3, %4 : vector<16x1xf32>
    %6 = vector.broadcast %5 : vector<16x1xf32> to vector<16x32xf32>
    %7 = arith.subf %0, %6 : vector<16x32xf32>
    %8 = arith.mulf %7, %7 : vector<16x32xf32>
    %cst_4 = arith.constant dense<0.000000e+00> : vector<16xf32>
    %9 = vector.multi_reduction <add>, %8, %cst_4 [1] : vector<16x32xf32> to vector<16xf32>
    %10 = vector.shape_cast %9 : vector<16xf32> to vector<16x1xf32>
    %cst_5 = arith.constant 3.200000e+01 : f32
    %11 = vector.broadcast %cst_5 : f32 to vector<16x1xf32>
    %12 = arith.divf %10, %11 : vector<16x1xf32>
    %13 = vector.broadcast %5 : vector<16x1xf32> to vector<16x32xf32>
    %14 = arith.subf %0, %13 : vector<16x32xf32>
    %cst_6 = arith.constant 9.99999996E-13 : f32
    %15 = vector.broadcast %cst_6 : f32 to vector<16x1xf32>
    %16 = arith.addf %12, %15 : vector<16x1xf32>
    %17 = math.rsqrt %16 : vector<16x1xf32>
    %18 = vector.broadcast %17 : vector<16x1xf32> to vector<16x32xf32>
    %19 = arith.mulf %14, %18 : vector<16x32xf32>
    %20 = vector.extract_strided_slice %1 {offsets = [0, 0], sizes = [1, 32], strides = [1, 1]} : vector<2x32xf32> to vector<1x32xf32>
    %21 = vector.broadcast %20 : vector<1x32xf32> to vector<16x32xf32>
    %22 = arith.mulf %19, %21 : vector<16x32xf32>
    %23 = vector.extract_strided_slice %1 {offsets = [1, 0], sizes = [1, 32], strides = [1, 1]} : vector<2x32xf32> to vector<1x32xf32>
    %24 = vector.broadcast %23 : vector<1x32xf32> to vector<16x32xf32>
    %25 = arith.addf %22, %24 : vector<16x32xf32>
    %c0_7 = arith.constant 0 : index
    %c0_8 = arith.constant 0 : index
    %c0_9 = arith.constant 0 : index
    %26 = vector.load %arg1[%c0_7, %c0_8, %c0_9] : memref<2x1x8xf32, #tpu.memory_space<vmem>>, vector<2x1x8xf32>
    %c0_10 = arith.constant 0 : index
    %c0_11 = arith.constant 0 : index
    %c0_12 = arith.constant 0 : index
    %27 = vector.load %arg3[%c0_10, %c0_11, %c0_12] : memref<2x32x96xbf16, #tpu.memory_space<vmem>>, vector<1x32x96xbf16>
    %28 = vector.shape_cast %27 : vector<1x32x96xbf16> to vector<32x96xbf16>
    %29 = arith.truncf %25 : vector<16x32xf32> to vector<16x32xbf16>
    %cst_13 = arith.constant dense<0.000000e+00> : vector<16x96xf32>
    %30 = tpu.matmul %29, %28, %cst_13 {dimension_numbers = #tpu.dot_dimension_numbers<[1], [0], [0], [1], [0, 0, 1, 1], [], []>} : vector<16x32xbf16>, vector<32x96xbf16>, vector<16x96xf32> -> vector<16x96xf32>
    %c0_14 = arith.constant 0 : index
    %c0_15 = arith.constant 0 : index
    %c0_16 = arith.constant 0 : index
    %31 = vector.load %arg4[%c0_14, %c0_15, %c0_16] : memref<2x1x96xf32, #tpu.memory_space<vmem>>, vector<1x1x96xf32>
    %32 = vector.shape_cast %31 : vector<1x1x96xf32> to vector<1x96xf32>
    %33 = vector.broadcast %32 : vector<1x96xf32> to vector<16x96xf32>
    %34 = arith.addf %30, %33 : vector<16x96xf32>
    %35 = vector.extract_strided_slice %34 {offsets = [0, 0], sizes = [16, 16], strides = [1, 1]} : vector<16x96xf32> to vector<16x16xf32>
    %36 = vector.shape_cast %35 : vector<16x16xf32> to vector<2x8x16xf32>
    %37 = vector.extract_strided_slice %34 {offsets = [0, 32], sizes = [16, 16], strides = [1, 1]} : vector<16x96xf32> to vector<16x16xf32>
    %38 = vector.shape_cast %37 : vector<16x16xf32> to vector<2x8x16xf32>
    %39 = vector.extract_strided_slice %34 {offsets = [0, 64], sizes = [16, 16], strides = [1, 1]} : vector<16x96xf32> to vector<16x16xf32>
    %40 = vector.shape_cast %39 : vector<16x16xf32> to vector<2x8x16xf32>
    %41 = arith.truncf %36 : vector<2x8x16xf32> to vector<2x8x16xbf16>
    %42 = arith.truncf %38 : vector<2x8x16xf32> to vector<2x8x16xbf16>
    "tpu.trace_start"() <{level = 10 : i32, message = "bqd,bkd->bqk"}> : () -> ()
    %cst_17 = arith.constant dense<0.000000e+00> : vector<2x8x8xf32>
    %43 = tpu.matmul %41, %42, %cst_17 {dimension_numbers = #tpu.dot_dimension_numbers<[2], [2], [1], [1], [0, 0, 0, 1, 1, 1], [0], [0]>} : vector<2x8x16xbf16>, vector<2x8x16xbf16>, vector<2x8x8xf32> -> vector<2x8x8xf32>
    "tpu.trace_stop"() : () -> ()
    %cst_18 = arith.constant 2.500000e-01 : f32
    %44 = vector.broadcast %cst_18 : f32 to vector<2x8x8xf32>
    %45 = arith.mulf %43, %44 : vector<2x8x8xf32>
    %46 = vector.broadcast %26 : vector<2x1x8xf32> to vector<2x8x8xf32>
    %47 = arith.addf %45, %46 : vector<2x8x8xf32>
    %cst_19 = arith.constant dense<0xFF800000> : vector<2x8xf32>
    %48 = vector.multi_reduction <maximumf>, %47, %cst_19 [2] : vector<2x8x8xf32> to vector<2x8xf32>
    %49 = vector.shape_cast %48 : vector<2x8xf32> to vector<2x8x1xf32>
    %50 = vector.broadcast %49 : vector<2x8x1xf32> to vector<2x8x8xf32>
    %51 = arith.subf %47, %50 : vector<2x8x8xf32>
    %52 = math.exp %51 : vector<2x8x8xf32>
    %cst_20 = arith.constant dense<0.000000e+00> : vector<2x8xf32>
    %53 = vector.multi_reduction <add>, %52, %cst_20 [2] : vector<2x8x8xf32> to vector<2x8xf32>
    %54 = vector.shape_cast %53 : vector<2x8xf32> to vector<2x8x1xf32>
    %55 = tpu.reciprocal %54 {approx = true} : vector<2x8x1xf32> -> vector<2x8x1xf32>
    %56 = vector.broadcast %55 : vector<2x8x1xf32> to vector<2x8x8xf32>
    %57 = arith.mulf %52, %56 : vector<2x8x8xf32>
    %58 = arith.truncf %57 : vector<2x8x8xf32> to vector<2x8x8xbf16>
    %59 = arith.truncf %40 : vector<2x8x16xf32> to vector<2x8x16xbf16>
    "tpu.trace_start"() <{level = 10 : i32, message = "bqk,bkd->bqd"}> : () -> ()
    %cst_21 = arith.constant dense<0.000000e+00> : vector<2x8x16xf32>
    %60 = tpu.matmul %58, %59, %cst_21 {dimension_numbers = #tpu.dot_dimension_numbers<[2], [1], [1], [2], [0, 0, 0, 1, 1, 2], [0], [0]>} : vector<2x8x8xbf16>, vector<2x8x16xbf16>, vector<2x8x16xf32> -> vector<2x8x16xf32>
    "tpu.trace_stop"() : () -> ()
    %61 = vector.shape_cast %60 : vector<2x8x16xf32> to vector<16x16xf32>
    %62 = vector.extract_strided_slice %34 {offsets = [0, 16], sizes = [16, 16], strides = [1, 1]} : vector<16x96xf32> to vector<16x16xf32>
    %63 = vector.shape_cast %62 : vector<16x16xf32> to vector<2x8x16xf32>
    %64 = vector.extract_strided_slice %34 {offsets = [0, 48], sizes = [16, 16], strides = [1, 1]} : vector<16x96xf32> to vector<16x16xf32>
    %65 = vector.shape_cast %64 : vector<16x16xf32> to vector<2x8x16xf32>
    %66 = vector.extract_strided_slice %34 {offsets = [0, 80], sizes = [16, 16], strides = [1, 1]} : vector<16x96xf32> to vector<16x16xf32>
    %67 = vector.shape_cast %66 : vector<16x16xf32> to vector<2x8x16xf32>
    %68 = arith.truncf %63 : vector<2x8x16xf32> to vector<2x8x16xbf16>
    %69 = arith.truncf %65 : vector<2x8x16xf32> to vector<2x8x16xbf16>
    "tpu.trace_start"() <{level = 10 : i32, message = "bqd,bkd->bqk"}> : () -> ()
    %cst_22 = arith.constant dense<0.000000e+00> : vector<2x8x8xf32>
    %70 = tpu.matmul %68, %69, %cst_22 {dimension_numbers = #tpu.dot_dimension_numbers<[2], [2], [1], [1], [0, 0, 0, 1, 1, 1], [0], [0]>} : vector<2x8x16xbf16>, vector<2x8x16xbf16>, vector<2x8x8xf32> -> vector<2x8x8xf32>
    "tpu.trace_stop"() : () -> ()
    %cst_23 = arith.constant 2.500000e-01 : f32
    %71 = vector.broadcast %cst_23 : f32 to vector<2x8x8xf32>
    %72 = arith.mulf %70, %71 : vector<2x8x8xf32>
    %73 = vector.broadcast %26 : vector<2x1x8xf32> to vector<2x8x8xf32>
    %74 = arith.addf %72, %73 : vector<2x8x8xf32>
    %cst_24 = arith.constant dense<0xFF800000> : vector<2x8xf32>
    %75 = vector.multi_reduction <maximumf>, %74, %cst_24 [2] : vector<2x8x8xf32> to vector<2x8xf32>
    %76 = vector.shape_cast %75 : vector<2x8xf32> to vector<2x8x1xf32>
    %77 = vector.broadcast %76 : vector<2x8x1xf32> to vector<2x8x8xf32>
    %78 = arith.subf %74, %77 : vector<2x8x8xf32>
    %79 = math.exp %78 : vector<2x8x8xf32>
    %cst_25 = arith.constant dense<0.000000e+00> : vector<2x8xf32>
    %80 = vector.multi_reduction <add>, %79, %cst_25 [2] : vector<2x8x8xf32> to vector<2x8xf32>
    %81 = vector.shape_cast %80 : vector<2x8xf32> to vector<2x8x1xf32>
    %82 = tpu.reciprocal %81 {approx = true} : vector<2x8x1xf32> -> vector<2x8x1xf32>
    %83 = vector.broadcast %82 : vector<2x8x1xf32> to vector<2x8x8xf32>
    %84 = arith.mulf %79, %83 : vector<2x8x8xf32>
    %85 = arith.truncf %84 : vector<2x8x8xf32> to vector<2x8x8xbf16>
    %86 = arith.truncf %67 : vector<2x8x16xf32> to vector<2x8x16xbf16>
    "tpu.trace_start"() <{level = 10 : i32, message = "bqk,bkd->bqd"}> : () -> ()
    %cst_26 = arith.constant dense<0.000000e+00> : vector<2x8x16xf32>
    %87 = tpu.matmul %85, %86, %cst_26 {dimension_numbers = #tpu.dot_dimension_numbers<[2], [1], [1], [2], [0, 0, 0, 1, 1, 2], [0], [0]>} : vector<2x8x8xbf16>, vector<2x8x16xbf16>, vector<2x8x16xf32> -> vector<2x8x16xf32>
    "tpu.trace_stop"() : () -> ()
    %88 = vector.shape_cast %87 : vector<2x8x16xf32> to vector<16x16xf32>
    %89 = tpu.concatenate %61, %88 in 1 : vector<16x16xf32>, vector<16x16xf32> -> vector<16x32xf32>
    %c0_27 = arith.constant 0 : index
    %c0_28 = arith.constant 0 : index
    %c0_29 = arith.constant 0 : index
    %90 = vector.load %arg5[%c0_27, %c0_28, %c0_29] : memref<2x32x32xbf16, #tpu.memory_space<vmem>>, vector<1x32x32xbf16>
    %91 = vector.shape_cast %90 : vector<1x32x32xbf16> to vector<32x32xbf16>
    %92 = arith.truncf %89 : vector<16x32xf32> to vector<16x32xbf16>
    %cst_30 = arith.constant dense<0.000000e+00> : vector<16x32xf32>
    %93 = tpu.matmul %92, %91, %cst_30 {dimension_numbers = #tpu.dot_dimension_numbers<[1], [0], [0], [1], [0, 0, 1, 1], [], []>} : vector<16x32xbf16>, vector<32x32xbf16>, vector<16x32xf32> -> vector<16x32xf32>
    %c0_31 = arith.constant 0 : index
    %c0_32 = arith.constant 0 : index
    %c0_33 = arith.constant 0 : index
    %94 = vector.load %arg6[%c0_31, %c0_32, %c0_33] : memref<2x1x32xf32, #tpu.memory_space<vmem>>, vector<1x1x32xf32>
    %95 = vector.shape_cast %94 : vector<1x1x32xf32> to vector<1x32xf32>
    %96 = vector.broadcast %95 : vector<1x32xf32> to vector<16x32xf32>
    %97 = arith.addf %93, %96 : vector<16x32xf32>
    %98 = arith.addf %97, %25 : vector<16x32xf32>
    %c0_34 = arith.constant 0 : index
    %c0_35 = arith.constant 0 : index
    %c0_36 = arith.constant 0 : index
    %99 = vector.load %arg7[%c0_34, %c0_35, %c0_36] : memref<2x2x32xf32, #tpu.memory_space<vmem>>, vector<1x2x32xf32>
    %100 = vector.shape_cast %99 : vector<1x2x32xf32> to vector<2x32xf32>
    %cst_37 = arith.constant dense<0.000000e+00> : vector<16xf32>
    %101 = vector.multi_reduction <add>, %98, %cst_37 [1] : vector<16x32xf32> to vector<16xf32>
    %102 = vector.shape_cast %101 : vector<16xf32> to vector<16x1xf32>
    %cst_38 = arith.constant 3.200000e+01 : f32
    %103 = vector.broadcast %cst_38 : f32 to vector<16x1xf32>
    %104 = arith.divf %102, %103 : vector<16x1xf32>
    %105 = vector.broadcast %104 : vector<16x1xf32> to vector<16x32xf32>
    %106 = arith.subf %98, %105 : vector<16x32xf32>
    %107 = arith.mulf %106, %106 : vector<16x32xf32>
    %cst_39 = arith.constant dense<0.000000e+00> : vector<16xf32>
    %108 = vector.multi_reduction <add>, %107, %cst_39 [1] : vector<16x32xf32> to vector<16xf32>
    %109 = vector.shape_cast %108 : vector<16xf32> to vector<16x1xf32>
    %cst_40 = arith.constant 3.200000e+01 : f32
    %110 = vector.broadcast %cst_40 : f32 to vector<16x1xf32>
    %111 = arith.divf %109, %110 : vector<16x1xf32>
    %112 = vector.broadcast %104 : vector<16x1xf32> to vector<16x32xf32>
    %113 = arith.subf %98, %112 : vector<16x32xf32>
    %cst_41 = arith.constant 9.99999996E-13 : f32
    %114 = vector.broadcast %cst_41 : f32 to vector<16x1xf32>
    %115 = arith.addf %111, %114 : vector<16x1xf32>
    %116 = math.rsqrt %115 : vector<16x1xf32>
    %117 = vector.broadcast %116 : vector<16x1xf32> to vector<16x32xf32>
    %118 = arith.mulf %113, %117 : vector<16x32xf32>
    %119 = vector.extract_strided_slice %100 {offsets = [0, 0], sizes = [1, 32], strides = [1, 1]} : vector<2x32xf32> to vector<1x32xf32>
    %120 = vector.broadcast %119 : vector<1x32xf32> to vector<16x32xf32>
    %121 = arith.mulf %118, %120 : vector<16x32xf32>
    %122 = vector.extract_strided_slice %100 {offsets = [1, 0], sizes = [1, 32], strides = [1, 1]} : vector<2x32xf32> to vector<1x32xf32>
    %123 = vector.broadcast %122 : vector<1x32xf32> to vector<16x32xf32>
    %124 = arith.addf %121, %123 : vector<16x32xf32>
    %c0_42 = arith.constant 0 : index
    %c0_43 = arith.constant 0 : index
    %c0_44 = arith.constant 0 : index
    %125 = vector.load %arg8[%c0_42, %c0_43, %c0_44] : memref<2x32x64xbf16, #tpu.memory_space<vmem>>, vector<1x32x64xbf16>
    %126 = vector.shape_cast %125 : vector<1x32x64xbf16> to vector<32x64xbf16>
    %127 = arith.truncf %124 : vector<16x32xf32> to vector<16x32xbf16>
    %cst_45 = arith.constant dense<0.000000e+00> : vector<16x64xf32>
    %128 = tpu.matmul %127, %126, %cst_45 {dimension_numbers = #tpu.dot_dimension_numbers<[1], [0], [0], [1], [0, 0, 1, 1], [], []>} : vector<16x32xbf16>, vector<32x64xbf16>, vector<16x64xf32> -> vector<16x64xf32>
    %c0_46 = arith.constant 0 : index
    %c0_47 = arith.constant 0 : index
    %c0_48 = arith.constant 0 : index
    %129 = vector.load %arg9[%c0_46, %c0_47, %c0_48] : memref<2x1x64xf32, #tpu.memory_space<vmem>>, vector<1x1x64xf32>
    %130 = vector.shape_cast %129 : vector<1x1x64xf32> to vector<1x64xf32>
    %131 = vector.broadcast %130 : vector<1x64xf32> to vector<16x64xf32>
    %132 = arith.addf %128, %131 : vector<16x64xf32>
    %cst_49 = arith.constant 5.000000e-01 : f32
    %133 = vector.broadcast %cst_49 : f32 to vector<16x64xf32>
    %134 = arith.mulf %133, %132 : vector<16x64xf32>
    %cst_50 = arith.constant 4.471500e-02 : f32
    %135 = vector.broadcast %cst_50 : f32 to vector<16x64xf32>
    %136 = arith.mulf %135, %132 : vector<16x64xf32>
    %137 = arith.mulf %136, %132 : vector<16x64xf32>
    %138 = arith.mulf %137, %132 : vector<16x64xf32>
    %139 = arith.addf %132, %138 : vector<16x64xf32>
    %cst_51 = arith.constant 0.797884583 : f32
    %140 = vector.broadcast %cst_51 : f32 to vector<16x64xf32>
    %141 = arith.mulf %140, %139 : vector<16x64xf32>
    %142 = math.tanh %141 : vector<16x64xf32>
    %cst_52 = arith.constant 1.000000e+00 : f32
    %143 = vector.broadcast %cst_52 : f32 to vector<16x64xf32>
    %144 = arith.addf %143, %142 : vector<16x64xf32>
    %145 = arith.mulf %134, %144 : vector<16x64xf32>
    %c0_53 = arith.constant 0 : index
    %c0_54 = arith.constant 0 : index
    %c0_55 = arith.constant 0 : index
    %146 = vector.load %arg10[%c0_53, %c0_54, %c0_55] : memref<2x64x32xbf16, #tpu.memory_space<vmem>>, vector<1x64x32xbf16>
    %147 = vector.shape_cast %146 : vector<1x64x32xbf16> to vector<64x32xbf16>
    %148 = arith.truncf %145 : vector<16x64xf32> to vector<16x64xbf16>
    %cst_56 = arith.constant dense<0.000000e+00> : vector<16x32xf32>
    %149 = tpu.matmul %148, %147, %cst_56 {dimension_numbers = #tpu.dot_dimension_numbers<[1], [0], [0], [1], [0, 0, 1, 1], [], []>} : vector<16x64xbf16>, vector<64x32xbf16>, vector<16x32xf32> -> vector<16x32xf32>
    %c0_57 = arith.constant 0 : index
    %c0_58 = arith.constant 0 : index
    %c0_59 = arith.constant 0 : index
    %150 = vector.load %arg11[%c0_57, %c0_58, %c0_59] : memref<2x1x32xf32, #tpu.memory_space<vmem>>, vector<1x1x32xf32>
    %151 = vector.shape_cast %150 : vector<1x1x32xf32> to vector<1x32xf32>
    %152 = vector.broadcast %151 : vector<1x32xf32> to vector<16x32xf32>
    %153 = arith.addf %149, %152 : vector<16x32xf32>
    %154 = arith.addf %153, %124 : vector<16x32xf32>
    %c0_60 = arith.constant 0 : index
    %c0_61 = arith.constant 0 : index
    %c0_62 = arith.constant 0 : index
    %155 = vector.load %arg12[%c0_60, %c0_61, %c0_62] : memref<2x2x32xf32, #tpu.memory_space<vmem>>, vector<1x2x32xf32>
    %156 = vector.shape_cast %155 : vector<1x2x32xf32> to vector<2x32xf32>
    %cst_63 = arith.constant dense<0.000000e+00> : vector<16xf32>
    %157 = vector.multi_reduction <add>, %154, %cst_63 [1] : vector<16x32xf32> to vector<16xf32>
    %158 = vector.shape_cast %157 : vector<16xf32> to vector<16x1xf32>
    %cst_64 = arith.constant 3.200000e+01 : f32
    %159 = vector.broadcast %cst_64 : f32 to vector<16x1xf32>
    %160 = arith.divf %158, %159 : vector<16x1xf32>
    %161 = vector.broadcast %160 : vector<16x1xf32> to vector<16x32xf32>
    %162 = arith.subf %154, %161 : vector<16x32xf32>
    %163 = arith.mulf %162, %162 : vector<16x32xf32>
    %cst_65 = arith.constant dense<0.000000e+00> : vector<16xf32>
    %164 = vector.multi_reduction <add>, %163, %cst_65 [1] : vector<16x32xf32> to vector<16xf32>
    %165 = vector.shape_cast %164 : vector<16xf32> to vector<16x1xf32>
    %cst_66 = arith.constant 3.200000e+01 : f32
    %166 = vector.broadcast %cst_66 : f32 to vector<16x1xf32>
    %167 = arith.divf %165, %166 : vector<16x1xf32>
    %168 = vector.broadcast %160 : vector<16x1xf32> to vector<16x32xf32>
    %169 = arith.subf %154, %168 : vector<16x32xf32>
    %cst_67 = arith.constant 9.99999996E-13 : f32
    %170 = vector.broadcast %cst_67 : f32 to vector<16x1xf32>
    %171 = arith.addf %167, %170 : vector<16x1xf32>
    %172 = math.rsqrt %171 : vector<16x1xf32>
    %173 = vector.broadcast %172 : vector<16x1xf32> to vector<16x32xf32>
    %174 = arith.mulf %169, %173 : vector<16x32xf32>
    %175 = vector.extract_strided_slice %156 {offsets = [0, 0], sizes = [1, 32], strides = [1, 1]} : vector<2x32xf32> to vector<1x32xf32>
    %176 = vector.broadcast %175 : vector<1x32xf32> to vector<16x32xf32>
    %177 = arith.mulf %174, %176 : vector<16x32xf32>
    %178 = vector.extract_strided_slice %156 {offsets = [1, 0], sizes = [1, 32], strides = [1, 1]} : vector<2x32xf32> to vector<1x32xf32>
    %179 = vector.broadcast %178 : vector<1x32xf32> to vector<16x32xf32>
    %180 = arith.addf %177, %179 : vector<16x32xf32>
    %c1 = arith.constant 1 : index
    %c0_68 = arith.constant 0 : index
    %c0_69 = arith.constant 0 : index
    %181 = vector.load %arg3[%c1, %c0_68, %c0_69] : memref<2x32x96xbf16, #tpu.memory_space<vmem>>, vector<1x32x96xbf16>
    %182 = vector.shape_cast %181 : vector<1x32x96xbf16> to vector<32x96xbf16>
    %183 = arith.truncf %180 : vector<16x32xf32> to vector<16x32xbf16>
    %cst_70 = arith.constant dense<0.000000e+00> : vector<16x96xf32>
    %184 = tpu.matmul %183, %182, %cst_70 {dimension_numbers = #tpu.dot_dimension_numbers<[1], [0], [0], [1], [0, 0, 1, 1], [], []>} : vector<16x32xbf16>, vector<32x96xbf16>, vector<16x96xf32> -> vector<16x96xf32>
    %c1_71 = arith.constant 1 : index
    %c0_72 = arith.constant 0 : index
    %c0_73 = arith.constant 0 : index
    %185 = vector.load %arg4[%c1_71, %c0_72, %c0_73] : memref<2x1x96xf32, #tpu.memory_space<vmem>>, vector<1x1x96xf32>
    %186 = vector.shape_cast %185 : vector<1x1x96xf32> to vector<1x96xf32>
    %187 = vector.broadcast %186 : vector<1x96xf32> to vector<16x96xf32>
    %188 = arith.addf %184, %187 : vector<16x96xf32>
    %189 = vector.extract_strided_slice %188 {offsets = [0, 0], sizes = [16, 16], strides = [1, 1]} : vector<16x96xf32> to vector<16x16xf32>
    %190 = vector.shape_cast %189 : vector<16x16xf32> to vector<2x8x16xf32>
    %191 = vector.extract_strided_slice %188 {offsets = [0, 32], sizes = [16, 16], strides = [1, 1]} : vector<16x96xf32> to vector<16x16xf32>
    %192 = vector.shape_cast %191 : vector<16x16xf32> to vector<2x8x16xf32>
    %193 = vector.extract_strided_slice %188 {offsets = [0, 64], sizes = [16, 16], strides = [1, 1]} : vector<16x96xf32> to vector<16x16xf32>
    %194 = vector.shape_cast %193 : vector<16x16xf32> to vector<2x8x16xf32>
    %195 = arith.truncf %190 : vector<2x8x16xf32> to vector<2x8x16xbf16>
    %196 = arith.truncf %192 : vector<2x8x16xf32> to vector<2x8x16xbf16>
    "tpu.trace_start"() <{level = 10 : i32, message = "bqd,bkd->bqk"}> : () -> ()
    %cst_74 = arith.constant dense<0.000000e+00> : vector<2x8x8xf32>
    %197 = tpu.matmul %195, %196, %cst_74 {dimension_numbers = #tpu.dot_dimension_numbers<[2], [2], [1], [1], [0, 0, 0, 1, 1, 1], [0], [0]>} : vector<2x8x16xbf16>, vector<2x8x16xbf16>, vector<2x8x8xf32> -> vector<2x8x8xf32>
    "tpu.trace_stop"() : () -> ()
    %cst_75 = arith.constant 2.500000e-01 : f32
    %198 = vector.broadcast %cst_75 : f32 to vector<2x8x8xf32>
    %199 = arith.mulf %197, %198 : vector<2x8x8xf32>
    %200 = vector.broadcast %26 : vector<2x1x8xf32> to vector<2x8x8xf32>
    %201 = arith.addf %199, %200 : vector<2x8x8xf32>
    %cst_76 = arith.constant dense<0xFF800000> : vector<2x8xf32>
    %202 = vector.multi_reduction <maximumf>, %201, %cst_76 [2] : vector<2x8x8xf32> to vector<2x8xf32>
    %203 = vector.shape_cast %202 : vector<2x8xf32> to vector<2x8x1xf32>
    %204 = vector.broadcast %203 : vector<2x8x1xf32> to vector<2x8x8xf32>
    %205 = arith.subf %201, %204 : vector<2x8x8xf32>
    %206 = math.exp %205 : vector<2x8x8xf32>
    %cst_77 = arith.constant dense<0.000000e+00> : vector<2x8xf32>
    %207 = vector.multi_reduction <add>, %206, %cst_77 [2] : vector<2x8x8xf32> to vector<2x8xf32>
    %208 = vector.shape_cast %207 : vector<2x8xf32> to vector<2x8x1xf32>
    %209 = tpu.reciprocal %208 {approx = true} : vector<2x8x1xf32> -> vector<2x8x1xf32>
    %210 = vector.broadcast %209 : vector<2x8x1xf32> to vector<2x8x8xf32>
    %211 = arith.mulf %206, %210 : vector<2x8x8xf32>
    %212 = arith.truncf %211 : vector<2x8x8xf32> to vector<2x8x8xbf16>
    %213 = arith.truncf %194 : vector<2x8x16xf32> to vector<2x8x16xbf16>
    "tpu.trace_start"() <{level = 10 : i32, message = "bqk,bkd->bqd"}> : () -> ()
    %cst_78 = arith.constant dense<0.000000e+00> : vector<2x8x16xf32>
    %214 = tpu.matmul %212, %213, %cst_78 {dimension_numbers = #tpu.dot_dimension_numbers<[2], [1], [1], [2], [0, 0, 0, 1, 1, 2], [0], [0]>} : vector<2x8x8xbf16>, vector<2x8x16xbf16>, vector<2x8x16xf32> -> vector<2x8x16xf32>
    "tpu.trace_stop"() : () -> ()
    %215 = vector.shape_cast %214 : vector<2x8x16xf32> to vector<16x16xf32>
    %216 = vector.extract_strided_slice %188 {offsets = [0, 16], sizes = [16, 16], strides = [1, 1]} : vector<16x96xf32> to vector<16x16xf32>
    %217 = vector.shape_cast %216 : vector<16x16xf32> to vector<2x8x16xf32>
    %218 = vector.extract_strided_slice %188 {offsets = [0, 48], sizes = [16, 16], strides = [1, 1]} : vector<16x96xf32> to vector<16x16xf32>
    %219 = vector.shape_cast %218 : vector<16x16xf32> to vector<2x8x16xf32>
    %220 = vector.extract_strided_slice %188 {offsets = [0, 80], sizes = [16, 16], strides = [1, 1]} : vector<16x96xf32> to vector<16x16xf32>
    %221 = vector.shape_cast %220 : vector<16x16xf32> to vector<2x8x16xf32>
    %222 = arith.truncf %217 : vector<2x8x16xf32> to vector<2x8x16xbf16>
    %223 = arith.truncf %219 : vector<2x8x16xf32> to vector<2x8x16xbf16>
    "tpu.trace_start"() <{level = 10 : i32, message = "bqd,bkd->bqk"}> : () -> ()
    %cst_79 = arith.constant dense<0.000000e+00> : vector<2x8x8xf32>
    %224 = tpu.matmul %222, %223, %cst_79 {dimension_numbers = #tpu.dot_dimension_numbers<[2], [2], [1], [1], [0, 0, 0, 1, 1, 1], [0], [0]>} : vector<2x8x16xbf16>, vector<2x8x16xbf16>, vector<2x8x8xf32> -> vector<2x8x8xf32>
    "tpu.trace_stop"() : () -> ()
    %cst_80 = arith.constant 2.500000e-01 : f32
    %225 = vector.broadcast %cst_80 : f32 to vector<2x8x8xf32>
    %226 = arith.mulf %224, %225 : vector<2x8x8xf32>
    %227 = vector.broadcast %26 : vector<2x1x8xf32> to vector<2x8x8xf32>
    %228 = arith.addf %226, %227 : vector<2x8x8xf32>
    %cst_81 = arith.constant dense<0xFF800000> : vector<2x8xf32>
    %229 = vector.multi_reduction <maximumf>, %228, %cst_81 [2] : vector<2x8x8xf32> to vector<2x8xf32>
    %230 = vector.shape_cast %229 : vector<2x8xf32> to vector<2x8x1xf32>
    %231 = vector.broadcast %230 : vector<2x8x1xf32> to vector<2x8x8xf32>
    %232 = arith.subf %228, %231 : vector<2x8x8xf32>
    %233 = math.exp %232 : vector<2x8x8xf32>
    %cst_82 = arith.constant dense<0.000000e+00> : vector<2x8xf32>
    %234 = vector.multi_reduction <add>, %233, %cst_82 [2] : vector<2x8x8xf32> to vector<2x8xf32>
    %235 = vector.shape_cast %234 : vector<2x8xf32> to vector<2x8x1xf32>
    %236 = tpu.reciprocal %235 {approx = true} : vector<2x8x1xf32> -> vector<2x8x1xf32>
    %237 = vector.broadcast %236 : vector<2x8x1xf32> to vector<2x8x8xf32>
    %238 = arith.mulf %233, %237 : vector<2x8x8xf32>
    %239 = arith.truncf %238 : vector<2x8x8xf32> to vector<2x8x8xbf16>
    %240 = arith.truncf %221 : vector<2x8x16xf32> to vector<2x8x16xbf16>
    "tpu.trace_start"() <{level = 10 : i32, message = "bqk,bkd->bqd"}> : () -> ()
    %cst_83 = arith.constant dense<0.000000e+00> : vector<2x8x16xf32>
    %241 = tpu.matmul %239, %240, %cst_83 {dimension_numbers = #tpu.dot_dimension_numbers<[2], [1], [1], [2], [0, 0, 0, 1, 1, 2], [0], [0]>} : vector<2x8x8xbf16>, vector<2x8x16xbf16>, vector<2x8x16xf32> -> vector<2x8x16xf32>
    "tpu.trace_stop"() : () -> ()
    %242 = vector.shape_cast %241 : vector<2x8x16xf32> to vector<16x16xf32>
    %243 = tpu.concatenate %215, %242 in 1 : vector<16x16xf32>, vector<16x16xf32> -> vector<16x32xf32>
    %c1_84 = arith.constant 1 : index
    %c0_85 = arith.constant 0 : index
    %c0_86 = arith.constant 0 : index
    %244 = vector.load %arg5[%c1_84, %c0_85, %c0_86] : memref<2x32x32xbf16, #tpu.memory_space<vmem>>, vector<1x32x32xbf16>
    %245 = vector.shape_cast %244 : vector<1x32x32xbf16> to vector<32x32xbf16>
    %246 = arith.truncf %243 : vector<16x32xf32> to vector<16x32xbf16>
    %cst_87 = arith.constant dense<0.000000e+00> : vector<16x32xf32>
    %247 = tpu.matmul %246, %245, %cst_87 {dimension_numbers = #tpu.dot_dimension_numbers<[1], [0], [0], [1], [0, 0, 1, 1], [], []>} : vector<16x32xbf16>, vector<32x32xbf16>, vector<16x32xf32> -> vector<16x32xf32>
    %c1_88 = arith.constant 1 : index
    %c0_89 = arith.constant 0 : index
    %c0_90 = arith.constant 0 : index
    %248 = vector.load %arg6[%c1_88, %c0_89, %c0_90] : memref<2x1x32xf32, #tpu.memory_space<vmem>>, vector<1x1x32xf32>
    %249 = vector.shape_cast %248 : vector<1x1x32xf32> to vector<1x32xf32>
    %250 = vector.broadcast %249 : vector<1x32xf32> to vector<16x32xf32>
    %251 = arith.addf %247, %250 : vector<16x32xf32>
    %252 = arith.addf %251, %180 : vector<16x32xf32>
    %c1_91 = arith.constant 1 : index
    %c0_92 = arith.constant 0 : index
    %c0_93 = arith.constant 0 : index
    %253 = vector.load %arg7[%c1_91, %c0_92, %c0_93] : memref<2x2x32xf32, #tpu.memory_space<vmem>>, vector<1x2x32xf32>
    %254 = vector.shape_cast %253 : vector<1x2x32xf32> to vector<2x32xf32>
    %cst_94 = arith.constant dense<0.000000e+00> : vector<16xf32>
    %255 = vector.multi_reduction <add>, %252, %cst_94 [1] : vector<16x32xf32> to vector<16xf32>
    %256 = vector.shape_cast %255 : vector<16xf32> to vector<16x1xf32>
    %cst_95 = arith.constant 3.200000e+01 : f32
    %257 = vector.broadcast %cst_95 : f32 to vector<16x1xf32>
    %258 = arith.divf %256, %257 : vector<16x1xf32>
    %259 = vector.broadcast %258 : vector<16x1xf32> to vector<16x32xf32>
    %260 = arith.subf %252, %259 : vector<16x32xf32>
    %261 = arith.mulf %260, %260 : vector<16x32xf32>
    %cst_96 = arith.constant dense<0.000000e+00> : vector<16xf32>
    %262 = vector.multi_reduction <add>, %261, %cst_96 [1] : vector<16x32xf32> to vector<16xf32>
    %263 = vector.shape_cast %262 : vector<16xf32> to vector<16x1xf32>
    %cst_97 = arith.constant 3.200000e+01 : f32
    %264 = vector.broadcast %cst_97 : f32 to vector<16x1xf32>
    %265 = arith.divf %263, %264 : vector<16x1xf32>
    %266 = vector.broadcast %258 : vector<16x1xf32> to vector<16x32xf32>
    %267 = arith.subf %252, %266 : vector<16x32xf32>
    %cst_98 = arith.constant 9.99999996E-13 : f32
    %268 = vector.broadcast %cst_98 : f32 to vector<16x1xf32>
    %269 = arith.addf %265, %268 : vector<16x1xf32>
    %270 = math.rsqrt %269 : vector<16x1xf32>
    %271 = vector.broadcast %270 : vector<16x1xf32> to vector<16x32xf32>
    %272 = arith.mulf %267, %271 : vector<16x32xf32>
    %273 = vector.extract_strided_slice %254 {offsets = [0, 0], sizes = [1, 32], strides = [1, 1]} : vector<2x32xf32> to vector<1x32xf32>
    %274 = vector.broadcast %273 : vector<1x32xf32> to vector<16x32xf32>
    %275 = arith.mulf %272, %274 : vector<16x32xf32>
    %276 = vector.extract_strided_slice %254 {offsets = [1, 0], sizes = [1, 32], strides = [1, 1]} : vector<2x32xf32> to vector<1x32xf32>
    %277 = vector.broadcast %276 : vector<1x32xf32> to vector<16x32xf32>
    %278 = arith.addf %275, %277 : vector<16x32xf32>
    %c1_99 = arith.constant 1 : index
    %c0_100 = arith.constant 0 : index
    %c0_101 = arith.constant 0 : index
    %279 = vector.load %arg8[%c1_99, %c0_100, %c0_101] : memref<2x32x64xbf16, #tpu.memory_space<vmem>>, vector<1x32x64xbf16>
    %280 = vector.shape_cast %279 : vector<1x32x64xbf16> to vector<32x64xbf16>
    %281 = arith.truncf %278 : vector<16x32xf32> to vector<16x32xbf16>
    %cst_102 = arith.constant dense<0.000000e+00> : vector<16x64xf32>
    %282 = tpu.matmul %281, %280, %cst_102 {dimension_numbers = #tpu.dot_dimension_numbers<[1], [0], [0], [1], [0, 0, 1, 1], [], []>} : vector<16x32xbf16>, vector<32x64xbf16>, vector<16x64xf32> -> vector<16x64xf32>
    %c1_103 = arith.constant 1 : index
    %c0_104 = arith.constant 0 : index
    %c0_105 = arith.constant 0 : index
    %283 = vector.load %arg9[%c1_103, %c0_104, %c0_105] : memref<2x1x64xf32, #tpu.memory_space<vmem>>, vector<1x1x64xf32>
    %284 = vector.shape_cast %283 : vector<1x1x64xf32> to vector<1x64xf32>
    %285 = vector.broadcast %284 : vector<1x64xf32> to vector<16x64xf32>
    %286 = arith.addf %282, %285 : vector<16x64xf32>
    %cst_106 = arith.constant 5.000000e-01 : f32
    %287 = vector.broadcast %cst_106 : f32 to vector<16x64xf32>
    %288 = arith.mulf %287, %286 : vector<16x64xf32>
    %cst_107 = arith.constant 4.471500e-02 : f32
    %289 = vector.broadcast %cst_107 : f32 to vector<16x64xf32>
    %290 = arith.mulf %289, %286 : vector<16x64xf32>
    %291 = arith.mulf %290, %286 : vector<16x64xf32>
    %292 = arith.mulf %291, %286 : vector<16x64xf32>
    %293 = arith.addf %286, %292 : vector<16x64xf32>
    %cst_108 = arith.constant 0.797884583 : f32
    %294 = vector.broadcast %cst_108 : f32 to vector<16x64xf32>
    %295 = arith.mulf %294, %293 : vector<16x64xf32>
    %296 = math.tanh %295 : vector<16x64xf32>
    %cst_109 = arith.constant 1.000000e+00 : f32
    %297 = vector.broadcast %cst_109 : f32 to vector<16x64xf32>
    %298 = arith.addf %297, %296 : vector<16x64xf32>
    %299 = arith.mulf %288, %298 : vector<16x64xf32>
    %c1_110 = arith.constant 1 : index
    %c0_111 = arith.constant 0 : index
    %c0_112 = arith.constant 0 : index
    %300 = vector.load %arg10[%c1_110, %c0_111, %c0_112] : memref<2x64x32xbf16, #tpu.memory_space<vmem>>, vector<1x64x32xbf16>
    %301 = vector.shape_cast %300 : vector<1x64x32xbf16> to vector<64x32xbf16>
    %302 = arith.truncf %299 : vector<16x64xf32> to vector<16x64xbf16>
    %cst_113 = arith.constant dense<0.000000e+00> : vector<16x32xf32>
    %303 = tpu.matmul %302, %301, %cst_113 {dimension_numbers = #tpu.dot_dimension_numbers<[1], [0], [0], [1], [0, 0, 1, 1], [], []>} : vector<16x64xbf16>, vector<64x32xbf16>, vector<16x32xf32> -> vector<16x32xf32>
    %c1_114 = arith.constant 1 : index
    %c0_115 = arith.constant 0 : index
    %c0_116 = arith.constant 0 : index
    %304 = vector.load %arg11[%c1_114, %c0_115, %c0_116] : memref<2x1x32xf32, #tpu.memory_space<vmem>>, vector<1x1x32xf32>
    %305 = vector.shape_cast %304 : vector<1x1x32xf32> to vector<1x32xf32>
    %306 = vector.broadcast %305 : vector<1x32xf32> to vector<16x32xf32>
    %307 = arith.addf %303, %306 : vector<16x32xf32>
    %308 = arith.addf %307, %278 : vector<16x32xf32>
    %c1_117 = arith.constant 1 : index
    %c0_118 = arith.constant 0 : index
    %c0_119 = arith.constant 0 : index
    %309 = vector.load %arg12[%c1_117, %c0_118, %c0_119] : memref<2x2x32xf32, #tpu.memory_space<vmem>>, vector<1x2x32xf32>
    %310 = vector.shape_cast %309 : vector<1x2x32xf32> to vector<2x32xf32>
    %cst_120 = arith.constant dense<0.000000e+00> : vector<16xf32>
    %311 = vector.multi_reduction <add>, %308, %cst_120 [1] : vector<16x32xf32> to vector<16xf32>
    %312 = vector.shape_cast %311 : vector<16xf32> to vector<16x1xf32>
    %cst_121 = arith.constant 3.200000e+01 : f32
    %313 = vector.broadcast %cst_121 : f32 to vector<16x1xf32>
    %314 = arith.divf %312, %313 : vector<16x1xf32>
    %315 = vector.broadcast %314 : vector<16x1xf32> to vector<16x32xf32>
    %316 = arith.subf %308, %315 : vector<16x32xf32>
    %317 = arith.mulf %316, %316 : vector<16x32xf32>
    %cst_122 = arith.constant dense<0.000000e+00> : vector<16xf32>
    %318 = vector.multi_reduction <add>, %317, %cst_122 [1] : vector<16x32xf32> to vector<16xf32>
    %319 = vector.shape_cast %318 : vector<16xf32> to vector<16x1xf32>
    %cst_123 = arith.constant 3.200000e+01 : f32
    %320 = vector.broadcast %cst_123 : f32 to vector<16x1xf32>
    %321 = arith.divf %319, %320 : vector<16x1xf32>
    %322 = vector.broadcast %314 : vector<16x1xf32> to vector<16x32xf32>
    %323 = arith.subf %308, %322 : vector<16x32xf32>
    %cst_124 = arith.constant 9.99999996E-13 : f32
    %324 = vector.broadcast %cst_124 : f32 to vector<16x1xf32>
    %325 = arith.addf %321, %324 : vector<16x1xf32>
    %326 = math.rsqrt %325 : vector<16x1xf32>
    %327 = vector.broadcast %326 : vector<16x1xf32> to vector<16x32xf32>
    %328 = arith.mulf %323, %327 : vector<16x32xf32>
    %329 = vector.extract_strided_slice %310 {offsets = [0, 0], sizes = [1, 32], strides = [1, 1]} : vector<2x32xf32> to vector<1x32xf32>
    %330 = vector.broadcast %329 : vector<1x32xf32> to vector<16x32xf32>
    %331 = arith.mulf %328, %330 : vector<16x32xf32>
    %332 = vector.extract_strided_slice %310 {offsets = [1, 0], sizes = [1, 32], strides = [1, 1]} : vector<2x32xf32> to vector<1x32xf32>
    %333 = vector.broadcast %332 : vector<1x32xf32> to vector<16x32xf32>
    %334 = arith.addf %331, %333 : vector<16x32xf32>
    %335 = vector.extract_strided_slice %334 {offsets = [0, 0], sizes = [1, 32], strides = [1, 1]} : vector<16x32xf32> to vector<1x32xf32>
    %336 = vector.extract_strided_slice %334 {offsets = [8, 0], sizes = [1, 32], strides = [1, 1]} : vector<16x32xf32> to vector<1x32xf32>
    %337 = tpu.concatenate %335, %336 in 0 : vector<1x32xf32>, vector<1x32xf32> -> vector<2x32xf32>
    %c0_125 = arith.constant 0 : index
    %c0_126 = arith.constant 0 : index
    %338 = vector.load %arg13[%c0_125, %c0_126] : memref<32x32xbf16, #tpu.memory_space<vmem>>, vector<32x32xbf16>
    %339 = arith.truncf %337 : vector<2x32xf32> to vector<2x32xbf16>
    %cst_127 = arith.constant dense<0.000000e+00> : vector<2x32xf32>
    %340 = tpu.matmul %339, %338, %cst_127 {dimension_numbers = #tpu.dot_dimension_numbers<[1], [0], [0], [1], [0, 0, 1, 1], [], []>} : vector<2x32xbf16>, vector<32x32xbf16>, vector<2x32xf32> -> vector<2x32xf32>
    %c0_128 = arith.constant 0 : index
    %c0_129 = arith.constant 0 : index
    %341 = vector.load %arg14[%c0_128, %c0_129] : memref<1x32xf32, #tpu.memory_space<vmem>>, vector<1x32xf32>
    %342 = vector.broadcast %341 : vector<1x32xf32> to vector<2x32xf32>
    %343 = arith.addf %340, %342 : vector<2x32xf32>
    %344 = math.tanh %343 : vector<2x32xf32>
    %c0_130 = arith.constant 0 : index
    %c0_131 = arith.constant 0 : index
    %345 = vector.load %arg15[%c0_130, %c0_131] : memref<32x3xf32, #tpu.memory_space<vmem>>, vector<32x3xf32>
    %cst_132 = arith.constant dense<0.000000e+00> : vector<2x3xf32>
    %346 = tpu.matmul %344, %345, %cst_132 {dimension_numbers = #tpu.dot_dimension_numbers<[1], [0], [0], [1], [0, 0, 1, 1], [], []>} : vector<2x32xf32>, vector<32x3xf32>, vector<2x3xf32> -> vector<2x3xf32>
    %c0_133 = arith.constant 0 : index
    %c0_134 = arith.constant 0 : index
    %347 = vector.load %arg16[%c0_133, %c0_134] : memref<1x3xf32, #tpu.memory_space<vmem>>, vector<1x3xf32>
    %348 = vector.broadcast %347 : vector<1x3xf32> to vector<2x3xf32>
    %349 = arith.addf %346, %348 : vector<2x3xf32>
    %c0_135 = arith.constant 0 : index
    %c0_136 = arith.constant 0 : index
    %350 = vector.load %arg17[%c0_135, %c0_136] : memref<2x3xf32, #tpu.memory_space<vmem>>, vector<2x3xf32>
    tpu.vector_store %arg17[%c0_135, %c0_136], %349 {strides = array<i32>} : memref<2x3xf32, #tpu.memory_space<vmem>>, vector<2x3xf32>,
    return
  }
}

</mosaic_0001>

<bundles_post_ra>
// kernel: network_forward.1
= control target key start
LH: loop header
LB: loop body
LE: loop exit
PB: predicated region body
PF: predicated region fallthrough
CT: control target
= control target key end

     0   :  { %s2996_s0 = inlined_call_operand.vmem [shape: f32[16,32], index: 0, kind: input, shape index: {}]   ;;  %s2997_s1 = inlined_call_operand.vmem [shape: f32[2,1,8], index: 1, kind: input, shape index: {}]   ;;  %s2998_s2 = inlined_call_operand.vmem [shape: f32[2,32], index: 2, kind: input, shape index: {}]   ;;  %s2999_s3 = inlined_call_operand.vmem [shape: bf16[2,32,96], index: 3, kind: input, shape index: {}]   ;;  %s3000_s4 = inlined_call_operand.vmem [shape: f32[2,1,96], index: 4, kind: input, shape index: {}]   ;;  %s3001_s5 = inlined_call_operand.vmem [shape: bf16[2,32,32], index: 5, kind: input, shape index: {}]   ;;  %s3002_s6 = inlined_call_operand.vmem [shape: f32[2,1,32], index: 6, kind: input, shape index: {}]   ;;  %s3003_s7 = inlined_call_operand.vmem [shape: f32[2,2,32], index: 7, kind: input, shape index: {}]   ;;  %s3004_s8 = inlined_call_operand.vmem [shape: bf16[2,32,64], index: 8, kind: input, shape index: {}]   ;;  %s3005_s9 = inlined_call_operand.vmem [shape: f32[2,1,64], index: 9, kind: input, shape index: {}]   ;;  %s3006_s10 = inlined_call_operand.vmem [shape: bf16[2,64,32], index: 10, kind: input, shape index: {}]   ;;  %s3007_s11 = inlined_call_operand.vmem [shape: f32[2,1,32], index: 11, kind: input, shape index: {}]   ;;  %s3008_s12 = inlined_call_operand.vmem [shape: f32[2,2,32], index: 12, kind: input, shape index: {}]   ;;  %s3009_s13 = inlined_call_operand.vmem [shape: bf16[32,32], index: 13, kind: input, shape index: {}]   ;;  %s3010_s14 = inlined_call_operand.vmem [shape: f32[1,32], index: 14, kind: input, shape index: {}]   ;;  %s3011_s15 = inlined_call_operand.vmem [shape: f32[32,3], index: 15, kind: input, shape index: {}]   ;;  %s3012_s16 = inlined_call_operand.vmem [shape: f32[1,3], index: 16, kind: input, shape index: {}]   ;;  %s3013_s17 = inlined_call_operand.hbm [shape: f32[2,3], index: 17, kind: output, shape index: {}]  }
   0x1   :  { %3016 = sst [smem:[#allocation5_spill]] %s2996_s0 }
   0x2   :  { %3017 = sst [smem:[#allocation6_spill]] %s2997_s1 }
   0x3   :  { %s3018_s26 = sld [smem:[#allocation5_spill]]  ;;  %vm61_vm0 = vcmask 261120  }
   0x9   :  { %v58_v0 = vld [vmem:[%s3018_s26] sm:$0xff]  ;;  %v59_v1 = vld [vmem:[%s3018_s26 + $0x8] sm:$0xff] }
   0xa   :  { %v62_v2 = vsel %vm61_vm0, %v58_v0, 0.0  ;;  %v65_v3 = vsel %vm61_vm0, %v59_v1, 0.0 }
   0xb   :  { %63 = vadd.xlane.f32.xlu0 %v62_v2 }
   0xf   :  { %66 = vadd.xlane.f32.xlu0 %v65_v3 }
  0x10   :  { %22 = vsyncpa [#allocation3], 0  ;;  %v2361_v14 = vld [vmem:[%s2999_s3] sm:$0xff]   ;;  %v2469_v15 = vmov 0.0   ;;  %v2362_v16 = vld [vmem:[%s2999_s3 + $0x8] sm:$0xff]   ;;  %vm2470_vm1 = vmmov 0   ;;  %v89_v21 = vlaneseq }
  0x11   :  { %2148 = vmatprep.subr.bf16.mxu0 %v2469_v15  ;;  %2156 = vmatprep.subr.bf16.mxu1 %v2469_v15  ;;  %v60_v26 = vld [vmem:[%s2998_s2] sm:$0x3]  ;;  %s2471_s21 = smov 96   ;;  %vm176_vm2 = vcmask 130048   ;;  %s3019_s24 = sld [smem:[#allocation6_spill]]  ;;  %vm288_vm3 = vcmask 64512  }
  0x12   :  { %2149 = vmatpush3.bf16.msra.mxu0 %v2361_v14  ;;  %2152 = vmatprep.mubr.msk.bf16.mxu0 %vm2470_vm1, %v2469_v15  ;;  %v90_v24 = vshrl.u32 %v89_v21, 7  ;;  %v1994_v39 = vld [vmem:[%s3000_s4] ss:$0 sm:$0xff]  ;;  %s2472_s27 = smov 64   ;;  %s2473_s28 = smov 80   ;;  %vm318_vm4 = vcmask 1043456  }
  0x13   :  { %2150 = vmatprep.subr.bf16.mxu0 %v2469_v15  ;;  %2158 = vmatprep.mubr.msk.bf16.mxu1 %vm2470_vm1, %v2469_v15  ;;  %s2474_s29 = smov 112   ;;  %s2475_s0 = smov 48   ;;  %vm879_vm5 = vcmask 523264   ;;  %vm1824_vm6 = vcmask 1040384   ;;  %vm1978_vm7 = vcmask 17408  }
  0x14   :  { %v2593_v25 = vsub.s32 0, %v90_v24  ;;  %v2599_v30 = vsub.s32 1, %v90_v24  ;;  %s2476_s2 = smov 16  }
  0x16   :  { %2151 = vmatpush3.bf16.msra.mxu0 %v2362_v16  ;;  %v92_v29 = vrot.slane %v60_v26, %v2593_v25  ;;  %v98_v34 = vrot.slane %v60_v26, %v2599_v30 }
  0x17   :  { %2162 = vmatprep.subr.bf16.mxu0 %v2469_v15  ;;  %v2637_v53 = vld [vmem:[%s3019_s24] ss:$0 sm:$0xff]  ;;  %v2642_v58 = vld [vmem:[%s3019_s24 + $0x1] ss:$0 sm:$0xff] }
  0x98   :  { %v64_v4 = vpop.xlane.xlu0 %63 }
  0x99   :  { %v69_v5 = vmul.f32 0.03125, %v64_v4 }
  0x9b   :  { %v71_v6 = vsub.f32 %v58_v0, %v69_v5 }
  0x9c   :  { %v67_v7 = vpop.xlane.xlu0 %66 }
  0x9d   :  { %v70_v8 = vmul.f32 0.03125, %v67_v7  ;;  %v73_v9 = vmul.f32 %v71_v6, %v71_v6 }
  0x9f   :  { %v72_v10 = vsub.f32 %v59_v1, %v70_v8  ;;  %v75_v11 = vsel %vm61_vm0, %v73_v9, 0.0 }
  0xa0   :  { %76 = vadd.xlane.f32.xlu1 %v75_v11 }
  0xa1   :  { %v74_v12 = vmul.f32 %v72_v10, %v72_v10 }
  0xa3   :  { %v78_v13 = vsel %vm61_vm0, %v74_v12, 0.0 }
  0xa4   :  { %79 = vadd.xlane.f32.xlu1 %v78_v13 }
 0x12d   :  { %v77_v17 = vpop.xlane.xlu1 %76 }
 0x12e   :  { %v81_v18 = vmul.f32 0.03125, %v77_v17 }
 0x130   :  { %v83_v19 = vadd.f32 1e-12, %v81_v18 }
 0x131   :  { %v80_v20 = vpop.xlane.xlu1 %79 }
 0x132   :  { %2383 = vrsqrt.f32 %v83_v19  ;;  %v82_v22 = vmul.f32 0.03125, %v80_v20 }
 0x134   :  { %v84_v23 = vadd.f32 1e-12, %v82_v22 }
 0x136   :  { %2385 = vrsqrt.f32 %v84_v23 }
 0x13c   :  { %v2384_v27 = vpop.eup %2383 }
 0x13d   :  { %v87_v28 = vmul.f32 %v2384_v27, %v71_v6 }
 0x13f   :  { %v93_v33 = vmul.f32 %v92_v29, %v87_v28 }
 0x140   :  { %v2386_v31 = vpop.eup %2385 }
 0x141   :  { %v88_v32 = vmul.f32 %v2386_v31, %v72_v10  ;;  %v2602_v36 = vadd.f32 %v98_v34, %v93_v33 }
 0x143   :  { %v94_v35 = vmul.f32 %v92_v29, %v88_v32 }
 0x145   :  { %v2604_v37 = vadd.f32 %v98_v34, %v94_v35 }
 0x147   :  { %v107_v38 = vpack.c.bf16 %v2604_v37, %v2602_v36 }
 0x149   :  { %2153 = vmatmul.mubr.msk.bf16.vlgmr.msra.gmra.mrb[0].mxu0 %vm61_vm0, %v107_v38 }
 0x14a   :  { %2164 = vmatprep.mubr.msk.bf16.mxu0 %vm2470_vm1, %v2469_v15 }
 0x21c   :  { %v164_v40 = vpop.f32.mrb[0].mxu0 }
 0x21d   :  { %v165_v41 = vadd.f32 %v1994_v39, %v164_v40  ;;  %v2154_v42 = vpop.f32.mrb[1].mxu0 }
 0x21e   :  { %v167_v43 = vpop.f32.mrb[2].mxu0 }
 0x21f   :  { %v2614_v44 = vpack.c.bf16 %v165_v41, %v165_v41  ;;  %v168_v45 = vadd.f32 %v1994_v39, %v167_v43  ;;  %v2155_v46 = vpop.f32.mrb[3].mxu0 }
 0x221   :  { %v2616_v47 = vpack.c.bf16 %v168_v45, %v168_v45  ;;  %174 = vrot.lane.b32.xlu0 %v2614_v44, %s2471_s21 }
 0x223   :  { %224 = vrot.lane.b32.xlu1 %v2616_v47, %s2471_s21 }
 0x293   :  { %v175_v48 = vpop.permute.xlu0 %174 }
 0x294   :  { %v181_v49 = vsel %vm176_vm2, %v175_v48, 0 }
 0x295   :  { %2157 = vmatpush3.bf16.xpose.msra.mxu1 %v181_v49  ;;  %v225_v50 = vpop.permute.xlu1 %224 }
 0x296   :  { %v230_v51 = vsel %vm176_vm2, %v225_v50, 0  ;;  %2168 = vmatprep.subr.bf16.mxu1 %v2469_v15 }
 0x297   :  { %2163 = vmatpush3.bf16.xpose.msra.mxu0 %v230_v51 }
 0x298   :  { %2174 = vmatprep.subr.bf16.mxu0 %v2469_v15 }
 0x29c   :  { %2159 = vmatmul.mubr.msk.bf16.vlgmr.msra.gmra.mrb[0].mxu1 %vm176_vm2, %v2614_v44 }
 0x29d   :  { %2170 = vmatprep.mubr.msk.bf16.mxu1 %vm2470_vm1, %v2469_v15 }
 0x29e   :  { %2165 = vmatmul.mubr.msk.bf16.vlgmr.msra.gmra.mrb[4].mxu0 %vm176_vm2, %v2616_v47 }
 0x29f   :  { %2176 = vmatprep.mubr.msk.bf16.mxu0 %vm2470_vm1, %v2469_v15 }
 0x36f   :  { %v217_v52 = vpop.f32.mrb[0].mxu1 }
 0x370   :  { %v272_v54 = vmul.f32 0.25, %v217_v52  ;;  %v2160_v55 = vpop.f32.mrb[1].mxu1 }
 0x371   :  { %v220_v56 = vpop.f32.mrb[2].mxu1  ;;  %v266_v57 = vpop.f32.mrb[4].mxu0 }
 0x372   :  { %v273_v59 = vmul.f32 0.25, %v266_v57  ;;  %v2161_v60 = vpop.f32.mrb[3].mxu1  ;;  %v2166_v61 = vpop.f32.mrb[5].mxu0  ;;  %v286_v62 = vadd.f32 %v2637_v53, %v272_v54 }
 0x373   :  { %v269_v63 = vpop.f32.mrb[6].mxu0 }
 0x374   :  { %v2167_v0 = vpop.f32.mrb[7].mxu0  ;;  %v289_v1 = vsel %vm288_vm3, %v286_v62, -inf  ;;  %v287_v2 = vadd.f32 %v2642_v58, %v273_v59 }
 0x375   :  { %290 = vmax.xlane.f32.xlu1 %v289_v1 }
 0x376   :  { %v292_v3 = vsel %vm288_vm3, %v287_v2, -inf }
 0x377   :  { %293 = vmax.xlane.f32.xlu0 %v292_v3 }
 0x386   :  { %362 = vrot.lane.b32.xlu1 %v2616_v47, %s2472_s27 }
 0x38a   :  { %412 = vrot.lane.b32.xlu1 %v2614_v44, %s2473_s28 }
 0x402   :  { %v291_v4 = vpop.xlane.xlu1 %290 }
 0x403   :  { %v295_v5 = vsub.f32 %v286_v62, %v291_v4 }
 0x404   :  { %v294_v6 = vpop.xlane.xlu0 %293 }
 0x405   :  { %v297_v7 = vmul.f32 1.442695, %v295_v5  ;;  %v296_v8 = vsub.f32 %v287_v2, %v294_v6 }
 0x406   :  { %v363_v9 = vpop.permute.xlu1 %362 }
 0x407   :  { %2387 = vpow2.f32 %v297_v7  ;;  %v299_v10 = vmul.f32 1.442695, %v296_v8  ;;  %v368_v11 = vsel %vm318_vm4, %v363_v9, 0 }
 0x408   :  { %2175 = vmatpush3.bf16.msra.mxu0 %v368_v11 }
 0x409   :  { %2389 = vpow2.f32 %v299_v10  ;;  %2186 = vmatprep.subr.bf16.mxu0 %v2469_v15 }
 0x40a   :  { %v413_v17 = vpop.permute.xlu1 %412 }
 0x40b   :  { %v418_v29 = vsel %vm176_vm2, %v413_v17, 0 }
 0x411   :  { %v2388_v12 = vpop.eup %2387 }
 0x412   :  { %v301_v13 = vsel %vm288_vm3, %v2388_v12, 0.0 }
 0x413   :  { %v2390_v14 = vpop.eup %2389  ;;  %302 = vadd.xlane.f32.xlu0 %v301_v13 }
 0x414   :  { %v304_v16 = vsel %vm288_vm3, %v2390_v14, 0.0 }
 0x415   :  { %305 = vadd.xlane.f32.xlu1 %v304_v16 }
 0x426   :  { %462 = vrot.lane.b32.xlu1 %v2616_v47, %s2473_s28 }
 0x429   :  { %313 = vrot.lane.b32.xlu0 %v2614_v44, %s2472_s27 }
 0x42a   :  { %460 = vrot.lane.b32.xlu1 %v2616_v47, %s2474_s29 }
 0x42d   :  { %410 = vrot.lane.b32.xlu0 %v2614_v44, %s2474_s29 }
 0x4a0   :  { %v303_v18 = vpop.xlane.xlu0 %302 }
 0x4a1   :  { %2391 = vrcp.f32 %v303_v18 }
 0x4a2   :  { %v306_v19 = vpop.xlane.xlu1 %305 }
 0x4a3   :  { %2393 = vrcp.f32 %v306_v19 }
 0x4a4   :  { %v314_v20 = vpop.permute.xlu0 %313 }
 0x4a5   :  { %v320_v21 = vsel %vm318_vm4, %v314_v20, 0  ;;  %v2363_v20 = vld [vmem:[%s3001_s5] sm:$0xff]  }
 0x4a6   :  { %2169 = vmatpush3.bf16.msra.mxu1 %v320_v21  ;;  %v463_v28 = vpop.permute.xlu1 %462  ;;  %v2364_v21 = vld [vmem:[%s3001_s5 + $0x8] sm:$0xff]  }
 0x4a7   :  { %2180 = vmatprep.subr.bf16.mxu1 %v2469_v15  ;;  %v468_v32 = vsel %vm176_vm2, %v463_v28, 0 }
 0x4a8   :  { %v411_v33 = vpop.permute.xlu0 %410 }
 0x4aa   :  { %v461_v34 = vpop.permute.xlu1 %460 }
 0x4ab   :  { %v2392_v22 = vpop.eup %2391 }
 0x4ac   :  { %v309_v23 = vmul.f32 %v2392_v22, %v2388_v12 }
 0x4ad   :  { %v2394_v24 = vpop.eup %2393 }
 0x4ae   :  { %v310_v26 = vmul.f32 %v2394_v24, %v2390_v14  ;;  %v311_v27 = vpack.c.bf16 %v309_v23, %v309_v23 }
 0x4b0   :  { %2171 = vmatmul.mubr.msk.bf16.vlgmr.msra.gmra.mrb[4].mxu1 %vm288_vm3, %v311_v27  ;;  %v312_v31 = vpack.c.bf16 %v310_v26, %v310_v26 }
 0x4b1   :  { %2181 = vmatpush3.bf16.xpose.msra.mxu1 %v418_v29  ;;  %2182 = vmatprep.mubr.msk.bf16.mxu1 %vm2470_vm1, %v2469_v15 }
 0x4b2   :  { %2177 = vmatmul.mubr.msk.bf16.vlgmr.msra.gmra.mrb[8].mxu0 %vm288_vm3, %v312_v31  ;;  %2192 = vmatprep.subr.bf16.mxu1 %v2469_v15 }
 0x4b3   :  { %2187 = vmatpush3.bf16.xpose.msra.mxu0 %v468_v32  ;;  %2188 = vmatprep.mubr.msk.bf16.mxu0 %vm2470_vm1, %v2469_v15 }
 0x4b4   :  { %2198 = vmatprep.subr.bf16.mxu0 %v2469_v15 }
 0x4b8   :  { %2183 = vmatmul.mubr.msk.bf16.vlgmr.msra.gmra.mrb[8].mxu1 %vm176_vm2, %v411_v33 }
 0x4b9   :  { %2194 = vmatprep.mubr.msk.bf16.mxu1 %vm2470_vm1, %v2469_v15 }
 0x4ba   :  { %2189 = vmatmul.mubr.msk.bf16.vlgmr.msra.gmra.mrb[12].mxu0 %vm176_vm2, %v461_v34 }
 0x4bb   :  { %2200 = vmatprep.mubr.msk.bf16.mxu0 %vm2470_vm1, %v2469_v15 }
 0x583   :  { %v2682_v35 = vpop.f32.mrb[4].mxu1 }
 0x584   :  { %v2172_v38 = vpop.f32.mrb[5].mxu1 }
 0x585   :  { %v359_v39 = vpop.f32.mrb[6].mxu1  ;;  %v2684_v40 = vpop.f32.mrb[8].mxu0 }
 0x586   :  { %v2173_v41 = vpop.f32.mrb[7].mxu1  ;;  %v2178_v42 = vpop.f32.mrb[9].mxu0 }
 0x587   :  { %v407_v43 = vpop.f32.mrb[10].mxu0 }
 0x588   :  { %v2179_v45 = vpop.f32.mrb[11].mxu0  ;;  %v2008_v43 = vld [vmem:[%s3002_s6] ss:$0 sm:$0xff] }
 0x58b   :  { %v454_v46 = vpop.f32.mrb[8].mxu1 }
 0x58c   :  { %v510_v48 = vmul.f32 0.25, %v454_v46  ;;  %v2184_v49 = vpop.f32.mrb[9].mxu1 }
 0x58d   :  { %v457_v50 = vpop.f32.mrb[10].mxu1  ;;  %v504_v51 = vpop.f32.mrb[12].mxu0 }
 0x58e   :  { %v511_v52 = vmul.f32 0.25, %v504_v51  ;;  %v2185_v54 = vpop.f32.mrb[11].mxu1  ;;  %v2190_v55 = vpop.f32.mrb[13].mxu0  ;;  %v512_v56 = vadd.f32 %v2637_v53, %v510_v48 }
 0x58f   :  { %v507_v57 = vpop.f32.mrb[14].mxu0 }
 0x590   :  { %v2191_v59 = vpop.f32.mrb[15].mxu0  ;;  %v514_v60 = vsel %vm288_vm3, %v512_v56, -inf  ;;  %v513_v61 = vadd.f32 %v2642_v58, %v511_v52 }
 0x591   :  { %515 = vmax.xlane.f32.xlu0 %v514_v60 }
 0x592   :  { %v517_v62 = vsel %vm288_vm3, %v513_v61, -inf }
 0x593   :  { %518 = vmax.xlane.f32.xlu1 %v517_v62 }
 0x5a4   :  { %586 = vrot.lane.b32.xlu1 %v2616_v47, %s2475_s0 }
 0x61e   :  { %v516_v63 = vpop.xlane.xlu0 %515 }
 0x61f   :  { %v520_v0 = vsub.f32 %v512_v56, %v516_v63 }
 0x620   :  { %v519_v1 = vpop.xlane.xlu1 %518 }
 0x621   :  { %v522_v2 = vmul.f32 1.442695, %v520_v0  ;;  %v521_v3 = vsub.f32 %v513_v61, %v519_v1  ;;  %v2366_v1 = vld [vmem:[%s3004_s8 + $0x8] sm:$0xff]  }
 0x623   :  { %2395 = vpow2.f32 %v522_v2  ;;  %v524_v4 = vmul.f32 1.442695, %v521_v3 }
 0x624   :  { %v587_v5 = vpop.permute.xlu1 %586 }
 0x625   :  { %2397 = vpow2.f32 %v524_v4  ;;  %v592_v6 = vsel %vm318_vm4, %v587_v5, 0 }
 0x626   :  { %2199 = vmatpush3.bf16.msra.mxu0 %v592_v6 }
 0x627   :  { %2212 = vmatprep.subr.bf16.mxu0 %v2469_v15 }
 0x62d   :  { %v2396_v7 = vpop.eup %2395 }
 0x62e   :  { %v526_v8 = vsel %vm288_vm3, %v2396_v7, 0.0 }
 0x62f   :  { %v2398_v9 = vpop.eup %2397  ;;  %527 = vadd.xlane.f32.xlu0 %v526_v8  ;;  %v714_v8 = vld [vmem:[%s3003_s7] sm:$0x3] }
 0x630   :  { %v529_v47 = vsel %vm288_vm3, %v2398_v9, 0.0 }
 0x633   :  { %530 = vadd.xlane.f32.xlu0 %v529_v47  ;;  %v744_v47 = vrot.slane %v714_v8, %v2593_v25 }
 0x649   :  { %538 = vrot.lane.b32.xlu0 %v2614_v44, %s2475_s0 }
 0x6bc   :  { %v528_v10 = vpop.xlane.xlu0 %527 }
 0x6bd   :  { %2399 = vrcp.f32 %v528_v10 }
 0x6c0   :  { %v531_v11 = vpop.xlane.xlu0 %530 }
 0x6c1   :  { %2401 = vrcp.f32 %v531_v11 }
 0x6c4   :  { %v539_v12 = vpop.permute.xlu0 %538 }
 0x6c5   :  { %v544_v13 = vsel %vm318_vm4, %v539_v12, 0 }
 0x6c6   :  { %2193 = vmatpush3.bf16.msra.mxu1 %v544_v13 }
 0x6c7   :  { %v2400_v14 = vpop.eup %2399  ;;  %2204 = vmatprep.subr.bf16.mxu1 %v2469_v15 }
 0x6c8   :  { %v534_v16 = vmul.f32 %v2400_v14, %v2396_v7  ;;  %v750_v14 = vrot.slane %v714_v8, %v2599_v30 }
 0x6ca   :  { %v536_v17 = vpack.c.bf16 %v534_v16, %v534_v16 }
 0x6cb   :  { %v2402_v18 = vpop.eup %2401 }
 0x6cc   :  { %v535_v19 = vmul.f32 %v2402_v18, %v2398_v9  ;;  %2195 = vmatmul.mubr.msk.bf16.vlgmr.msra.gmra.mrb[12].mxu1 %vm288_vm3, %v536_v17 }
 0x6cd   :  { %2208 = vmatprep.mubr.msk.bf16.mxu1 %vm2470_vm1, %v2469_v15  ;;  %2205 = vmatpush3.bf16.msra.mxu1 %v2363_v20  ;;  %v2368_v20 = vld [vmem:[%s3006_s10 + $0x8] sm:$0xff]  }
 0x6ce   :  { %v537_v44 = vpack.c.bf16 %v535_v19, %v535_v19  ;;  %2206 = vmatprep.subr.bf16.mxu1 %v2469_v15 }
 0x6d0   :  { %2201 = vmatmul.mubr.msk.bf16.vlgmr.msra.gmra.mrb[16].mxu0 %vm288_vm3, %v537_v44  ;;  %v2367_v44 = vld [vmem:[%s3006_s10] sm:$0xff]  }
 0x6d1   :  { %2216 = vmatprep.mubr.msk.bf16.mxu0 %vm2470_vm1, %v2469_v15  ;;  %2207 = vmatpush3.bf16.msra.mxu1 %v2364_v21  ;;  %v2369_v21 = vld [vmem:[%s3006_s10 + $0x10] sm:$0xff]  }
 0x6d2   :  { %2220 = vmatprep.subr.bf16.mxu1 %v2469_v15 }
 0x79f   :  { %v580_v22 = vpop.f32.mrb[12].mxu1 }
 0x7a0   :  { %v2196_v23 = vpop.f32.mrb[13].mxu1 }
 0x7a1   :  { %v583_v24 = vpop.f32.mrb[14].mxu1  ;;  %v2012_v23 = vld [vmem:[%s3005_s9] ss:$0 sm:$0xff] }
 0x7a2   :  { %v2197_v26 = vpop.f32.mrb[15].mxu1 }
 0x7a3   :  { %v628_v27 = vpop.f32.mrb[16].mxu0 }
 0x7a4   :  { %v2351_v28 = vpack.i.bf16 %v628_v27, %v580_v22  ;;  %v2202_v29 = vpop.f32.mrb[17].mxu0  ;;  %v2370_v22 = vld [vmem:[%s3006_s10 + $0x18] sm:$0xff]  }
 0x7a5   :  { %v631_v31 = vpop.f32.mrb[18].mxu0 }
 0x7a6   :  { %2352 = vrot.lane.b32.xlu1 %v2351_v28, %s2476_s2  ;;  %v2203_v32 = vpop.f32.mrb[19].mxu0 }
 0x818   :  { %v2353_v33 = vpop.permute.xlu1 %2352 }
 0x819   :  { %v2355_v34 = vunpack.i.h.bf16 %v2353_v33  ;;  %v2354_v38 = vunpack.i.l.bf16 %v2353_v33 }
 0x81b   :  { %v643_v39 = vsel %vm176_vm2, %v2684_v40, %v2355_v34  ;;  %v642_v41 = vsel %vm176_vm2, %v2682_v35, %v2354_v38 }
 0x81c   :  { %v648_v42 = vpack.c.bf16 %v643_v39, %v642_v41 }
 0x81e   :  { %2209 = vmatmul.mubr.msk.bf16.vlgmr.msra.gmra.mrb[16].mxu1 %vm61_vm0, %v648_v42 }
 0x81f   :  { %2228 = vmatprep.mubr.msk.bf16.mxu1 %vm2470_vm1, %v2469_v15  ;;  %2221 = vmatpush3.bf16.msra.mxu1 %v2367_v44  ;;  %v926_v44 = vld [vmem:[%s3008_s12] sm:$0x3] }
 0x820   :  { %2222 = vmatprep.subr.bf16.mxu1 %v2469_v15 }
 0x823   :  { %2223 = vmatpush3.bf16.msra.mxu1 %v2368_v20  ;;  %v956_v20 = vrot.slane %v926_v44, %v2593_v25 }
 0x824   :  { %2224 = vmatprep.subr.bf16.mxu1 %v2469_v15 }
 0x827   :  { %2225 = vmatpush3.bf16.msra.mxu1 %v2369_v21 }
 0x828   :  { %2226 = vmatprep.subr.bf16.mxu1 %v2469_v15 }
 0x82b   :  { %2227 = vmatpush3.bf16.msra.mxu1 %v2370_v22 }
 0x82c   :  { %2246 = vmatprep.subr.bf16.mxu1 %v2469_v15 }
 0x8f1   :  { %v705_v45 = vpop.f32.mrb[16].mxu1 }
 0x8f2   :  { %v706_v46 = vadd.f32 %v2008_v43, %v705_v45  ;;  %v2210_v48 = vpop.f32.mrb[17].mxu1 }
 0x8f3   :  { %v708_v49 = vpop.f32.mrb[18].mxu1 }
 0x8f4   :  { %v709_v50 = vadd.f32 %v2008_v43, %v708_v49  ;;  %v2211_v51 = vpop.f32.mrb[19].mxu1  ;;  %v712_v40 = vadd.f32 %v706_v46, %v2602_v36 }
 0x8f6   :  { %v715_v35 = vsel %vm61_vm0, %v712_v40, 0.0  ;;  %v713_v52 = vadd.f32 %v709_v50, %v2604_v37  ;;  %v2365_v37 = vld [vmem:[%s3004_s8] sm:$0xff]  }
 0x8f7   :  { %716 = vadd.xlane.f32.xlu1 %v715_v35  ;;  %2213 = vmatpush3.bf16.msra.mxu0 %v2365_v37 }
 0x8f8   :  { %v718_v54 = vsel %vm61_vm0, %v713_v52, 0.0  ;;  %2214 = vmatprep.subr.bf16.mxu0 %v2469_v15 }
 0x8f9   :  { %719 = vadd.xlane.f32.xlu0 %v718_v54 }
 0x8fb   :  { %2215 = vmatpush3.bf16.msra.mxu0 %v2366_v1 }
 0x8fc   :  { %2232 = vmatprep.subr.bf16.mxu0 %v2469_v15 }
 0x984   :  { %v717_v55 = vpop.xlane.xlu1 %716 }
 0x985   :  { %v721_v56 = vmul.f32 0.03125, %v717_v55 }
 0x986   :  { %v720_v57 = vpop.xlane.xlu0 %719 }
 0x987   :  { %v723_v59 = vsub.f32 %v712_v40, %v721_v56  ;;  %v722_v60 = vmul.f32 0.03125, %v720_v57  ;;  %v2016_v56 = vld [vmem:[%s3007_s11] ss:$0 sm:$0xff] }
 0x989   :  { %v724_v61 = vsub.f32 %v713_v52, %v722_v60  ;;  %v725_v62 = vmul.f32 %v723_v59, %v723_v59 }
 0x98b   :  { %v727_v63 = vsel %vm61_vm0, %v725_v62, 0.0  ;;  %v726_v0 = vmul.f32 %v724_v61, %v724_v61 }
 0x98c   :  { %728 = vadd.xlane.f32.xlu0 %v727_v63 }
 0x98d   :  { %v730_v36 = vsel %vm61_vm0, %v726_v0, 0.0 }
 0x990   :  { %731 = vadd.xlane.f32.xlu0 %v730_v36 }
 0xa19   :  { %v729_v2 = vpop.xlane.xlu0 %728 }
 0xa1a   :  { %v733_v3 = vmul.f32 0.03125, %v729_v2 }
 0xa1c   :  { %v735_v4 = vadd.f32 1e-12, %v733_v3 }
 0xa1d   :  { %v732_v5 = vpop.xlane.xlu0 %731 }
 0xa1e   :  { %2403 = vrsqrt.f32 %v735_v4  ;;  %v734_v6 = vmul.f32 0.03125, %v732_v5 }
 0xa20   :  { %v736_v7 = vadd.f32 1e-12, %v734_v6 }
 0xa22   :  { %2405 = vrsqrt.f32 %v736_v7 }
 0xa28   :  { %v2404_v9 = vpop.eup %2403 }
 0xa29   :  { %v739_v10 = vmul.f32 %v2404_v9, %v723_v59 }
 0xa2b   :  { %v745_v12 = vmul.f32 %v744_v47, %v739_v10 }
 0xa2c   :  { %v2406_v11 = vpop.eup %2405 }
 0xa2d   :  { %v740_v13 = vmul.f32 %v2406_v11, %v724_v61  ;;  %v751_v17 = vadd.f32 %v750_v14, %v745_v12  ;;  %v2371_v11 = vld [vmem:[%s2999_s3 + $0x10] sm:$0xff]   ;;  %v2372_v12 = vld [vmem:[%s2999_s3 + $0x18] sm:$0xff]  }
 0xa2f   :  { %v746_v16 = vmul.f32 %v744_v47, %v740_v13 }
 0xa31   :  { %v752_v18 = vadd.f32 %v750_v14, %v746_v16 }
 0xa33   :  { %v757_v19 = vpack.c.bf16 %v752_v18, %v751_v17 }
 0xa35   :  { %2217 = vmatmul.mubr.msk.bf16.vlgmr.msra.gmra.mrb[20].mxu0 %vm61_vm0, %v757_v19 }
 0xa36   :  { %2236 = vmatprep.mubr.msk.bf16.mxu0 %vm2470_vm1, %v2469_v15  ;;  %2233 = vmatpush3.bf16.msra.mxu0 %v2371_v11 }
 0xa37   :  { %2234 = vmatprep.subr.bf16.mxu0 %v2469_v15 }
 0xa3a   :  { %2235 = vmatpush3.bf16.msra.mxu0 %v2372_v12 }
 0xa3b   :  { %2240 = vmatprep.subr.bf16.mxu0 %v2469_v15 }
 0xb08   :  { %v814_v24 = vpop.f32.mrb[20].mxu0 }
 0xb09   :  { %v815_v26 = vadd.f32 %v2012_v23, %v814_v24  ;;  %v2218_v27 = vpop.f32.mrb[21].mxu0 }
 0xb0a   :  { %v817_v28 = vpop.f32.mrb[22].mxu0  ;;  %v962_v27 = vrot.slane %v926_v44, %v2599_v30 }
 0xb0b   :  { %v823_v29 = vmul.f32 0.044715, %v815_v26  ;;  %v818_v31 = vadd.f32 %v2012_v23, %v817_v28  ;;  %v2219_v32 = vpop.f32.mrb[23].mxu0  ;;  %v821_v51 = vmul.f32 0.5, %v815_v26 }
 0xb0d   :  { %v825_v33 = vmul.f32 %v823_v29, %v815_v26  ;;  %v824_v34 = vmul.f32 0.044715, %v818_v31  ;;  %v822_v40 = vmul.f32 0.5, %v818_v31 }
 0xb0f   :  { %v827_v38 = vmul.f32 %v825_v33, %v815_v26  ;;  %v826_v39 = vmul.f32 %v824_v34, %v818_v31  ;;  %v2027_v33 = vld [vmem:[%s3000_s4 + $0x1] ss:$0 sm:$0xff] }
 0xb11   :  { %v829_v41 = vadd.f32 %v827_v38, %v815_v26  ;;  %v828_v42 = vmul.f32 %v826_v39, %v818_v31 }
 0xb13   :  { %v831_v43 = vmul.f32 0.7978846, %v829_v41  ;;  %v830_v45 = vadd.f32 %v828_v42, %v818_v31 }
 0xb15   :  { %2407 = vtanh.f32 %v831_v43  ;;  %v832_v46 = vmul.f32 0.7978846, %v830_v45 }
 0xb17   :  { %2409 = vtanh.f32 %v832_v46 }
 0xb1f   :  { %v2408_v48 = vpop.eup %2407 }
 0xb20   :  { %v835_v49 = vadd.f32 1.0, %v2408_v48 }
 0xb21   :  { %v2410_v50 = vpop.eup %2409 }
 0xb22   :  { %v836_v35 = vadd.f32 1.0, %v2410_v50  ;;  %v837_v52 = vmul.f32 %v835_v49, %v821_v51 }
 0xb24   :  { %v838_v54 = vmul.f32 %v836_v35, %v822_v40 }
 0xb26   :  { %v847_v55 = vpack.c.bf16 %v838_v54, %v837_v52 }
 0xb28   :  { %2229 = vmatmul.mubr.msk.bf16.vlgmr.msra.gmra.mrb[20].mxu1 %vm879_vm5, %v847_v55 }
 0xb29   :  { %2248 = vmatprep.mubr.msk.bf16.mxu1 %vm2470_vm1, %v2469_v15 }
 0xbfb   :  { %v917_v57 = vpop.f32.mrb[20].mxu1 }
 0xbfc   :  { %v918_v59 = vadd.f32 %v2016_v56, %v917_v57  ;;  %v2230_v60 = vpop.f32.mrb[21].mxu1 }
 0xbfd   :  { %v920_v61 = vpop.f32.mrb[22].mxu1 }
 0xbfe   :  { %v921_v62 = vadd.f32 %v2016_v56, %v920_v61  ;;  %v2231_v63 = vpop.f32.mrb[23].mxu1  ;;  %v924_v0 = vadd.f32 %v918_v59, %v751_v17 }
 0xc00   :  { %v927_v36 = vsel %vm61_vm0, %v924_v0, 0.0  ;;  %v925_v37 = vadd.f32 %v921_v62, %v752_v18 }
 0xc01   :  { %928 = vadd.xlane.f32.xlu1 %v927_v36 }
 0xc02   :  { %v930_v1 = vsel %vm61_vm0, %v925_v37, 0.0 }
 0xc03   :  { %931 = vadd.xlane.f32.xlu0 %v930_v1 }
 0xc8e   :  { %v929_v2 = vpop.xlane.xlu1 %928 }
 0xc8f   :  { %v933_v3 = vmul.f32 0.03125, %v929_v2 }
 0xc90   :  { %v932_v4 = vpop.xlane.xlu0 %931 }
 0xc91   :  { %v935_v5 = vsub.f32 %v924_v0, %v933_v3  ;;  %v934_v6 = vmul.f32 0.03125, %v932_v4 }
 0xc93   :  { %v936_v7 = vsub.f32 %v925_v37, %v934_v6  ;;  %v937_v8 = vmul.f32 %v935_v5, %v935_v5 }
 0xc95   :  { %v939_v9 = vsel %vm61_vm0, %v937_v8, 0.0  ;;  %v938_v47 = vmul.f32 %v936_v7, %v936_v7 }
 0xc96   :  { %940 = vadd.xlane.f32.xlu1 %v939_v9 }
 0xc97   :  { %v942_v10 = vsel %vm61_vm0, %v938_v47, 0.0 }
 0xc98   :  { %943 = vadd.xlane.f32.xlu0 %v942_v10 }
 0xd23   :  { %v941_v13 = vpop.xlane.xlu1 %940 }
 0xd24   :  { %v945_v14 = vmul.f32 0.03125, %v941_v13 }
 0xd25   :  { %v944_v16 = vpop.xlane.xlu0 %943 }
 0xd26   :  { %v947_v17 = vadd.f32 1e-12, %v945_v14  ;;  %v946_v18 = vmul.f32 0.03125, %v944_v16 }
 0xd28   :  { %2411 = vrsqrt.f32 %v947_v17  ;;  %v948_v19 = vadd.f32 1e-12, %v946_v18 }
 0xd2a   :  { %2413 = vrsqrt.f32 %v948_v19 }
 0xd32   :  { %v2412_v21 = vpop.eup %2411 }
 0xd33   :  { %v951_v22 = vmul.f32 %v2412_v21, %v935_v5 }
 0xd34   :  { %v2414_v23 = vpop.eup %2413 }
 0xd35   :  { %v957_v24 = vmul.f32 %v956_v20, %v951_v22  ;;  %v952_v26 = vmul.f32 %v2414_v23, %v936_v7 }
 0xd37   :  { %v958_v28 = vmul.f32 %v956_v20, %v952_v26  ;;  %v2789_v29 = vadd.f32 %v962_v27, %v957_v24 }
 0xd39   :  { %v2791_v31 = vadd.f32 %v962_v27, %v958_v28 }
 0xd3b   :  { %v970_v32 = vpack.c.bf16 %v2791_v31, %v2789_v29 }
 0xd3d   :  { %2237 = vmatmul.mubr.msk.bf16.vlgmr.msra.gmra.mrb[24].mxu0 %vm61_vm0, %v970_v32 }
 0xd3e   :  { %2242 = vmatprep.mubr.msk.bf16.mxu0 %vm2470_vm1, %v2469_v15 }
 0xe10   :  { %v1028_v34 = vpop.f32.mrb[24].mxu0 }
 0xe11   :  { %v1029_v38 = vadd.f32 %v2027_v33, %v1028_v34  ;;  %v2238_v39 = vpop.f32.mrb[25].mxu0 }
 0xe12   :  { %v1031_v41 = vpop.f32.mrb[26].mxu0 }
 0xe13   :  { %v2801_v42 = vpack.c.bf16 %v1029_v38, %v1029_v38  ;;  %v1032_v43 = vadd.f32 %v2027_v33, %v1031_v41  ;;  %v2239_v45 = vpop.f32.mrb[27].mxu0 }
 0xe15   :  { %v2803_v46 = vpack.c.bf16 %v1032_v43, %v1032_v43  ;;  %1038 = vrot.lane.b32.xlu1 %v2801_v42, %s2471_s21 }
 0xe17   :  { %1087 = vrot.lane.b32.xlu0 %v2803_v46, %s2471_s21 }
 0xe87   :  { %v1039_v48 = vpop.permute.xlu1 %1038 }
 0xe88   :  { %v1044_v49 = vsel %vm176_vm2, %v1039_v48, 0 }
 0xe89   :  { %2241 = vmatpush3.bf16.xpose.msra.mxu0 %v1044_v49  ;;  %v1088_v50 = vpop.permute.xlu0 %1087 }
 0xe8a   :  { %v1093_v51 = vsel %vm176_vm2, %v1088_v50, 0  ;;  %2252 = vmatprep.subr.bf16.mxu0 %v2469_v15 }
 0xe8b   :  { %2247 = vmatpush3.bf16.xpose.msra.mxu1 %v1093_v51 }
 0xe8c   :  { %2258 = vmatprep.subr.bf16.mxu1 %v2469_v15 }
 0xe90   :  { %2243 = vmatmul.mubr.msk.bf16.vlgmr.msra.gmra.mrb[28].mxu0 %vm176_vm2, %v2801_v42 }
 0xe91   :  { %2254 = vmatprep.mubr.msk.bf16.mxu0 %vm2470_vm1, %v2469_v15 }
 0xe92   :  { %2249 = vmatmul.mubr.msk.bf16.vlgmr.msra.gmra.mrb[24].mxu1 %vm176_vm2, %v2803_v46 }
 0xe93   :  { %2260 = vmatprep.mubr.msk.bf16.mxu1 %vm2470_vm1, %v2469_v15 }
 0xf63   :  { %v1080_v40 = vpop.f32.mrb[28].mxu0 }
 0xf64   :  { %v1135_v35 = vmul.f32 0.25, %v1080_v40  ;;  %v2244_v52 = vpop.f32.mrb[29].mxu0 }
 0xf65   :  { %v1083_v54 = vpop.f32.mrb[30].mxu0  ;;  %v1129_v55 = vpop.f32.mrb[24].mxu1 }
 0xf66   :  { %v1136_v56 = vmul.f32 0.25, %v1129_v55  ;;  %v2245_v57 = vpop.f32.mrb[31].mxu0  ;;  %v2250_v59 = vpop.f32.mrb[25].mxu1  ;;  %v1137_v60 = vadd.f32 %v2637_v53, %v1135_v35 }
 0xf67   :  { %v1132_v61 = vpop.f32.mrb[26].mxu1 }
 0xf68   :  { %v2251_v62 = vpop.f32.mrb[27].mxu1  ;;  %v1139_v63 = vsel %vm288_vm3, %v1137_v60, -inf  ;;  %v1138_v0 = vadd.f32 %v2642_v58, %v1136_v56 }
 0xf69   :  { %1140 = vmax.xlane.f32.xlu1 %v1139_v63 }
 0xf6a   :  { %v1142_v36 = vsel %vm288_vm3, %v1138_v0, -inf }
 0xf6b   :  { %1143 = vmax.xlane.f32.xlu0 %v1142_v36 }
 0xf7a   :  { %1163 = vrot.lane.b32.xlu1 %v2801_v42, %s2472_s27 }
 0xff6   :  { %v1141_v37 = vpop.xlane.xlu1 %1140 }
 0xff7   :  { %v1145_v1 = vsub.f32 %v1137_v60, %v1141_v37 }
 0xff8   :  { %v1144_v2 = vpop.xlane.xlu0 %1143 }
 0xff9   :  { %v1147_v3 = vmul.f32 1.442695, %v1145_v1  ;;  %v1146_v4 = vsub.f32 %v1138_v0, %v1144_v2 }
 0xffa   :  { %v1164_v5 = vpop.permute.xlu1 %1163 }
 0xffb   :  { %2415 = vpow2.f32 %v1147_v3  ;;  %v1149_v6 = vmul.f32 1.442695, %v1146_v4  ;;  %v1169_v7 = vsel %vm318_vm4, %v1164_v5, 0 }
 0xffc   :  { %2253 = vmatpush3.bf16.msra.mxu0 %v1169_v7 }
 0xffd   :  { %2417 = vpow2.f32 %v1149_v6  ;;  %2264 = vmatprep.subr.bf16.mxu0 %v2469_v15 }
0x1005   :  { %v2416_v8 = vpop.eup %2415 }
0x1006   :  { %v1151_v9 = vsel %vm288_vm3, %v2416_v8, 0.0 }
0x1007   :  { %v2418_v47 = vpop.eup %2417  ;;  %1152 = vadd.xlane.f32.xlu1 %v1151_v9 }
0x1008   :  { %v1154_v10 = vsel %vm288_vm3, %v2418_v47, 0.0 }
0x1009   :  { %1155 = vadd.xlane.f32.xlu0 %v1154_v10 }
0x1018   :  { %1261 = vrot.lane.b32.xlu1 %v2801_v42, %s2473_s28 }
0x101c   :  { %1311 = vrot.lane.b32.xlu1 %v2803_v46, %s2473_s28 }
0x101f   :  { %1211 = vrot.lane.b32.xlu0 %v2803_v46, %s2472_s27 }
0x1020   :  { %1259 = vrot.lane.b32.xlu1 %v2801_v42, %s2474_s29 }
0x1023   :  { %1309 = vrot.lane.b32.xlu0 %v2803_v46, %s2474_s29 }
0x1094   :  { %v1153_v11 = vpop.xlane.xlu1 %1152 }
0x1095   :  { %2419 = vrcp.f32 %v1153_v11 }
0x1096   :  { %v1156_v12 = vpop.xlane.xlu0 %1155 }
0x1097   :  { %2421 = vrcp.f32 %v1156_v12  ;;  %v2373_v12 = vld [vmem:[%s3001_s5 + $0x10] sm:$0xff]  }
0x1098   :  { %v1262_v16 = vpop.permute.xlu1 %1261 }
0x1099   :  { %v1267_v22 = vsel %vm176_vm2, %v1262_v16, 0 }
0x109a   :  { %v1212_v13 = vpop.permute.xlu0 %1211 }
0x109b   :  { %v1217_v14 = vsel %vm318_vm4, %v1212_v13, 0  ;;  %v2374_v13 = vld [vmem:[%s3001_s5 + $0x18] sm:$0xff]  }
0x109c   :  { %2259 = vmatpush3.bf16.msra.mxu1 %v1217_v14  ;;  %v1312_v21 = vpop.permute.xlu1 %1311 }
0x109d   :  { %2270 = vmatprep.subr.bf16.mxu1 %v2469_v15  ;;  %v1317_v24 = vsel %vm176_vm2, %v1312_v21, 0 }
0x109e   :  { %v1310_v27 = vpop.permute.xlu0 %1309 }
0x109f   :  { %v2420_v17 = vpop.eup %2419 }
0x10a0   :  { %v1159_v18 = vmul.f32 %v2420_v17, %v2416_v8  ;;  %v1260_v26 = vpop.permute.xlu1 %1259 }
0x10a1   :  { %v2422_v19 = vpop.eup %2421 }
0x10a2   :  { %v1160_v44 = vmul.f32 %v2422_v19, %v2418_v47  ;;  %v1161_v20 = vpack.c.bf16 %v1159_v18, %v1159_v18 }
0x10a4   :  { %2255 = vmatmul.mubr.msk.bf16.vlgmr.msra.gmra.mrb[32].mxu0 %vm288_vm3, %v1161_v20  ;;  %v1162_v23 = vpack.c.bf16 %v1160_v44, %v1160_v44 }
0x10a5   :  { %2265 = vmatpush3.bf16.xpose.msra.mxu0 %v1267_v22  ;;  %2266 = vmatprep.mubr.msk.bf16.mxu0 %vm2470_vm1, %v2469_v15 }
0x10a6   :  { %2261 = vmatmul.mubr.msk.bf16.vlgmr.msra.gmra.mrb[28].mxu1 %vm288_vm3, %v1162_v23  ;;  %2276 = vmatprep.subr.bf16.mxu0 %v2469_v15 }
0x10a7   :  { %2271 = vmatpush3.bf16.xpose.msra.mxu1 %v1317_v24  ;;  %2272 = vmatprep.mubr.msk.bf16.mxu1 %vm2470_vm1, %v2469_v15 }
0x10a8   :  { %2282 = vmatprep.subr.bf16.mxu1 %v2469_v15 }
0x10ac   :  { %2267 = vmatmul.mubr.msk.bf16.vlgmr.msra.gmra.mrb[36].mxu0 %vm176_vm2, %v1260_v26 }
0x10ad   :  { %2278 = vmatprep.mubr.msk.bf16.mxu0 %vm2470_vm1, %v2469_v15 }
0x10ae   :  { %2273 = vmatmul.mubr.msk.bf16.vlgmr.msra.gmra.mrb[32].mxu1 %vm176_vm2, %v1310_v27 }
0x10af   :  { %2284 = vmatprep.mubr.msk.bf16.mxu1 %vm2470_vm1, %v2469_v15 }
0x1177   :  { %v2859_v28 = vpop.f32.mrb[32].mxu0 }
0x1178   :  { %v2256_v32 = vpop.f32.mrb[33].mxu0 }
0x1179   :  { %v1208_v33 = vpop.f32.mrb[34].mxu0  ;;  %v2861_v34 = vpop.f32.mrb[28].mxu1 }
0x117a   :  { %v2257_v38 = vpop.f32.mrb[35].mxu0  ;;  %v2262_v39 = vpop.f32.mrb[29].mxu1 }
0x117b   :  { %v1256_v41 = vpop.f32.mrb[30].mxu1  ;;  %v2044_v38 = vld [vmem:[%s3002_s6 + $0x1] ss:$0 sm:$0xff] }
0x117c   :  { %v2263_v43 = vpop.f32.mrb[31].mxu1 }
0x117f   :  { %v1303_v45 = vpop.f32.mrb[36].mxu0 }
0x1180   :  { %v1359_v48 = vmul.f32 0.25, %v1303_v45  ;;  %v2268_v49 = vpop.f32.mrb[37].mxu0 }
0x1181   :  { %v1306_v50 = vpop.f32.mrb[38].mxu0  ;;  %v1353_v51 = vpop.f32.mrb[32].mxu1 }
0x1182   :  { %v1360_v40 = vmul.f32 0.25, %v1353_v51  ;;  %v2269_v35 = vpop.f32.mrb[39].mxu0  ;;  %v2274_v52 = vpop.f32.mrb[33].mxu1  ;;  %v1361_v54 = vadd.f32 %v2637_v53, %v1359_v48 }
0x1183   :  { %v1356_v55 = vpop.f32.mrb[34].mxu1 }
0x1184   :  { %v2275_v56 = vpop.f32.mrb[35].mxu1  ;;  %v1363_v57 = vsel %vm288_vm3, %v1361_v54, -inf  ;;  %v1362_v59 = vadd.f32 %v2642_v58, %v1360_v40 }
0x1185   :  { %1364 = vmax.xlane.f32.xlu1 %v1363_v57 }
0x1186   :  { %v1366_v60 = vsel %vm288_vm3, %v1362_v59, -inf }
0x1187   :  { %1367 = vmax.xlane.f32.xlu0 %v1366_v60 }
0x1196   :  { %1387 = vrot.lane.b32.xlu1 %v2801_v42, %s2475_s0 }
0x1212   :  { %v1365_v61 = vpop.xlane.xlu1 %1364 }
0x1213   :  { %v1369_v62 = vsub.f32 %v1361_v54, %v1365_v61  ;;  %v2376_v61 = vld [vmem:[%s3004_s8 + $0x18] sm:$0xff]  }
0x1214   :  { %v1368_v63 = vpop.xlane.xlu0 %1367 }
0x1215   :  { %v1371_v0 = vmul.f32 1.442695, %v1369_v62  ;;  %v1370_v36 = vsub.f32 %v1362_v59, %v1368_v63 }
0x1216   :  { %v1388_v37 = vpop.permute.xlu1 %1387 }
0x1217   :  { %2423 = vpow2.f32 %v1371_v0  ;;  %v1373_v53 = vmul.f32 1.442695, %v1370_v36  ;;  %v1393_v1 = vsel %vm318_vm4, %v1388_v37, 0 }
0x1218   :  { %2277 = vmatpush3.bf16.msra.mxu0 %v1393_v1  ;;  %v2048_v1 = vld [vmem:[%s3003_s7 + $0x2] sm:$0x3] }
0x1219   :  { %2425 = vpow2.f32 %v1373_v53  ;;  %2288 = vmatprep.subr.bf16.mxu0 %v2469_v15 }
0x1221   :  { %v2424_v58 = vpop.eup %2423 }
0x1222   :  { %v1375_v2 = vsel %vm288_vm3, %v2424_v58, 0.0 }
0x1223   :  { %v2426_v3 = vpop.eup %2425  ;;  %1376 = vadd.xlane.f32.xlu0 %v1375_v2 }
0x1224   :  { %v1378_v42 = vsel %vm288_vm3, %v2426_v3, 0.0 }
0x1227   :  { %1379 = vadd.xlane.f32.xlu0 %v1378_v42 }
0x123d   :  { %1435 = vrot.lane.b32.xlu0 %v2803_v46, %s2475_s0 }
0x12b0   :  { %v1377_v4 = vpop.xlane.xlu0 %1376 }
0x12b1   :  { %2427 = vrcp.f32 %v1377_v4 }
0x12b4   :  { %v1380_v5 = vpop.xlane.xlu0 %1379 }
0x12b5   :  { %2429 = vrcp.f32 %v1380_v5 }
0x12b8   :  { %v1436_v6 = vpop.permute.xlu0 %1435 }
0x12b9   :  { %v1441_v7 = vsel %vm318_vm4, %v1436_v6, 0  ;;  %v1602_v6 = vrot.slane %v2048_v1, %v2599_v30 }
0x12ba   :  { %2283 = vmatpush3.bf16.msra.mxu1 %v1441_v7 }
0x12bb   :  { %v2428_v8 = vpop.eup %2427  ;;  %2296 = vmatprep.subr.bf16.mxu1 %v2469_v15 }
0x12bc   :  { %v1383_v9 = vmul.f32 %v2428_v8, %v2424_v58  ;;  %v1596_v58 = vrot.slane %v2048_v1, %v2593_v25 }
0x12be   :  { %v1385_v47 = vpack.c.bf16 %v1383_v9, %v1383_v9 }
0x12bf   :  { %v2430_v10 = vpop.eup %2429 }
0x12c0   :  { %v1384_v11 = vmul.f32 %v2430_v10, %v2426_v3  ;;  %2279 = vmatmul.mubr.msk.bf16.vlgmr.msra.gmra.mrb[40].mxu0 %vm288_vm3, %v1385_v47  ;;  %v2377_v10 = vld [vmem:[%s3006_s10 + $0x20] sm:$0xff]  }
0x12c1   :  { %2292 = vmatprep.mubr.msk.bf16.mxu0 %vm2470_vm1, %v2469_v15  ;;  %2289 = vmatpush3.bf16.msra.mxu0 %v2373_v12  ;;  %v2380_v12 = vld [vmem:[%s3006_s10 + $0x38] sm:$0xff]  }
0x12c2   :  { %v1386_v46 = vpack.c.bf16 %v1384_v11, %v1384_v11  ;;  %2290 = vmatprep.subr.bf16.mxu0 %v2469_v15  ;;  %v2378_v11 = vld [vmem:[%s3006_s10 + $0x28] sm:$0xff]  }
0x12c4   :  { %2285 = vmatmul.mubr.msk.bf16.vlgmr.msra.gmra.mrb[36].mxu1 %vm288_vm3, %v1386_v46  ;;  %v2379_v46 = vld [vmem:[%s3006_s10 + $0x30] sm:$0xff]  }
0x12c5   :  { %2300 = vmatprep.mubr.msk.bf16.mxu1 %vm2470_vm1, %v2469_v15  ;;  %2291 = vmatpush3.bf16.msra.mxu0 %v2374_v13  ;;  %v2054_v13 = vld [vmem:[%s3005_s9 + $0x1] ss:$0 sm:$0xff] }
0x12c6   :  { %2304 = vmatprep.subr.bf16.mxu0 %v2469_v15 }
0x1393   :  { %v1429_v14 = vpop.f32.mrb[40].mxu0 }
0x1394   :  { %v2280_v16 = vpop.f32.mrb[41].mxu0 }
0x1395   :  { %v1432_v17 = vpop.f32.mrb[42].mxu0 }
0x1396   :  { %v2281_v18 = vpop.f32.mrb[43].mxu0 }
0x1397   :  { %v1477_v19 = vpop.f32.mrb[36].mxu1 }
0x1398   :  { %v2356_v44 = vpack.i.bf16 %v1477_v19, %v1429_v14  ;;  %v2286_v20 = vpop.f32.mrb[37].mxu1 }
0x1399   :  { %v1480_v21 = vpop.f32.mrb[38].mxu1 }
0x139a   :  { %v2287_v22 = vpop.f32.mrb[39].mxu1  ;;  %2357 = vrot.lane.b32.xlu1 %v2356_v44, %s2476_s2 }
0x140c   :  { %v2358_v23 = vpop.permute.xlu1 %2357 }
0x140d   :  { %v2360_v24 = vunpack.i.h.bf16 %v2358_v23  ;;  %v2359_v26 = vunpack.i.l.bf16 %v2358_v23 }
0x140f   :  { %v1492_v27 = vsel %vm176_vm2, %v2861_v34, %v2360_v24  ;;  %v1491_v32 = vsel %vm176_vm2, %v2859_v28, %v2359_v26 }
0x1410   :  { %v1498_v33 = vpack.c.bf16 %v1492_v27, %v1491_v32 }
0x1412   :  { %2293 = vmatmul.mubr.msk.bf16.vlgmr.msra.gmra.mrb[44].mxu0 %vm61_vm0, %v1498_v33 }
0x1413   :  { %2312 = vmatprep.mubr.msk.bf16.mxu0 %vm2470_vm1, %v2469_v15  ;;  %2305 = vmatpush3.bf16.msra.mxu0 %v2377_v10 }
0x1414   :  { %2306 = vmatprep.subr.bf16.mxu0 %v2469_v15 }
0x1417   :  { %2307 = vmatpush3.bf16.msra.mxu0 %v2378_v11 }
0x1418   :  { %2308 = vmatprep.subr.bf16.mxu0 %v2469_v15 }
0x141b   :  { %2309 = vmatpush3.bf16.msra.mxu0 %v2379_v46 }
0x141c   :  { %2310 = vmatprep.subr.bf16.mxu0 %v2469_v15 }
0x141f   :  { %2311 = vmatpush3.bf16.msra.mxu0 %v2380_v12 }
0x14e5   :  { %v1556_v39 = vpop.f32.mrb[44].mxu0 }
0x14e6   :  { %v1557_v41 = vadd.f32 %v2044_v38, %v1556_v39  ;;  %v2294_v43 = vpop.f32.mrb[45].mxu0 }
0x14e7   :  { %v1559_v45 = vpop.f32.mrb[46].mxu0 }
0x14e8   :  { %v1560_v48 = vadd.f32 %v2044_v38, %v1559_v45  ;;  %v2295_v49 = vpop.f32.mrb[47].mxu0  ;;  %v1563_v34 = vadd.f32 %v1557_v41, %v2789_v29 }
0x14ea   :  { %v1567_v28 = vsel %vm61_vm0, %v1563_v34, 0.0  ;;  %v1564_v50 = vadd.f32 %v1560_v48, %v2791_v31  ;;  %v2375_v31 = vld [vmem:[%s3004_s8 + $0x10] sm:$0xff]  }
0x14eb   :  { %1568 = vadd.xlane.f32.xlu1 %v1567_v28  ;;  %2297 = vmatpush3.bf16.msra.mxu1 %v2375_v31 }
0x14ec   :  { %v1570_v51 = vsel %vm61_vm0, %v1564_v50, 0.0  ;;  %2298 = vmatprep.subr.bf16.mxu1 %v2469_v15 }
0x14ed   :  { %1571 = vadd.xlane.f32.xlu0 %v1570_v51  ;;  %v2067_v51 = vld [vmem:[%s3007_s11 + $0x1] ss:$0 sm:$0xff] }
0x14ef   :  { %2299 = vmatpush3.bf16.msra.mxu1 %v2376_v61 }
0x14f0   :  { %2316 = vmatprep.subr.bf16.mxu1 %v2469_v15 }
0x1578   :  { %v1569_v40 = vpop.xlane.xlu1 %1568 }
0x1579   :  { %v1573_v35 = vmul.f32 0.03125, %v1569_v40 }
0x157a   :  { %v1572_v52 = vpop.xlane.xlu0 %1571 }
0x157b   :  { %v1575_v54 = vsub.f32 %v1563_v34, %v1573_v35  ;;  %v1574_v55 = vmul.f32 0.03125, %v1572_v52 }
0x157d   :  { %v1576_v56 = vsub.f32 %v1564_v50, %v1574_v55  ;;  %v1577_v57 = vmul.f32 %v1575_v54, %v1575_v54 }
0x157f   :  { %v1579_v59 = vsel %vm61_vm0, %v1577_v57, 0.0  ;;  %v1578_v60 = vmul.f32 %v1576_v56, %v1576_v56 }
0x1580   :  { %1580 = vadd.xlane.f32.xlu0 %v1579_v59 }
0x1581   :  { %v1582_v29 = vsel %vm61_vm0, %v1578_v60, 0.0 }
0x1582   :  { %1583 = vadd.xlane.f32.xlu1 %v1582_v29 }
0x160d   :  { %v1581_v62 = vpop.xlane.xlu0 %1580 }
0x160e   :  { %v1585_v63 = vmul.f32 0.03125, %v1581_v62 }
0x160f   :  { %v1584_v0 = vpop.xlane.xlu1 %1583 }
0x1610   :  { %v1587_v36 = vadd.f32 1e-12, %v1585_v63  ;;  %v1586_v37 = vmul.f32 0.03125, %v1584_v0 }
0x1612   :  { %2431 = vrsqrt.f32 %v1587_v36  ;;  %v1588_v53 = vadd.f32 1e-12, %v1586_v37 }
0x1614   :  { %2433 = vrsqrt.f32 %v1588_v53 }
0x161c   :  { %v2432_v2 = vpop.eup %2431 }
0x161d   :  { %v1591_v3 = vmul.f32 %v2432_v2, %v1575_v54  ;;  %v2381_v2 = vld [vmem:[%s3009_s13] sm:$0xff]  }
0x161e   :  { %v2434_v42 = vpop.eup %2433 }
0x161f   :  { %v1597_v4 = vmul.f32 %v1596_v58, %v1591_v3  ;;  %v1592_v5 = vmul.f32 %v2434_v42, %v1576_v56  ;;  %v2382_v3 = vld [vmem:[%s3009_s13 + $0x8] sm:$0xff]  }
0x1621   :  { %v1598_v7 = vmul.f32 %v1596_v58, %v1592_v5  ;;  %v1603_v8 = vadd.f32 %v1602_v6, %v1597_v4 }
0x1623   :  { %v1604_v9 = vadd.f32 %v1602_v6, %v1598_v7 }
0x1625   :  { %v1610_v47 = vpack.c.bf16 %v1604_v9, %v1603_v8 }
0x1627   :  { %2301 = vmatmul.mubr.msk.bf16.vlgmr.msra.gmra.mrb[40].mxu1 %vm61_vm0, %v1610_v47 }
0x1628   :  { %2320 = vmatprep.mubr.msk.bf16.mxu1 %vm2470_vm1, %v2469_v15  ;;  %2317 = vmatpush3.bf16.msra.mxu1 %v2381_v2 }
0x1629   :  { %2318 = vmatprep.subr.bf16.mxu1 %v2469_v15 }
0x162c   :  { %2319 = vmatpush3.bf16.msra.mxu1 %v2382_v3 }
0x16fa   :  { %v1668_v14 = vpop.f32.mrb[40].mxu1 }
0x16fb   :  { %v1669_v16 = vadd.f32 %v2054_v13, %v1668_v14  ;;  %v2302_v17 = vpop.f32.mrb[41].mxu1 }
0x16fc   :  { %v1671_v18 = vpop.f32.mrb[42].mxu1 }
0x16fd   :  { %v1677_v19 = vmul.f32 0.044715, %v1669_v16  ;;  %v1672_v44 = vadd.f32 %v2054_v13, %v1671_v18  ;;  %v2303_v20 = vpop.f32.mrb[43].mxu1  ;;  %v1675_v45 = vmul.f32 0.5, %v1669_v16 }
0x16ff   :  { %v1679_v21 = vmul.f32 %v1677_v19, %v1669_v16  ;;  %v1678_v22 = vmul.f32 0.044715, %v1672_v44  ;;  %v1676_v48 = vmul.f32 0.5, %v1672_v44 }
0x1701   :  { %v1681_v23 = vmul.f32 %v1679_v21, %v1669_v16  ;;  %v1680_v24 = vmul.f32 %v1678_v22, %v1672_v44  ;;  %v1896_v21 = vld [vmem:[%s3011_s15 + $0x10] sm:$0xff]  ;;  %v2477_v22 = vmov 0.0|0.0  }
0x1702   :  { %2335 = vmatprep.subr.bf16.mxu1 %v2477_v22 }
0x1703   :  { %v1683_v26 = vadd.f32 %v1681_v23, %v1669_v16  ;;  %v1682_v27 = vmul.f32 %v1680_v24, %v1672_v44  ;;  %v1897_v24 = vld [vmem:[%s3011_s15 + $0x18] sm:$0xff] }
0x1705   :  { %v1685_v32 = vmul.f32 0.7978846, %v1683_v26  ;;  %v1684_v33 = vadd.f32 %v1682_v27, %v1672_v44  ;;  %v2074_v26 = vld [vmem:[%s3010_s14] ss:$0 sm:$0xff] }
0x1707   :  { %2435 = vtanh.f32 %v1685_v32  ;;  %v1686_v38 = vmul.f32 0.7978846, %v1684_v33 }
0x1709   :  { %2437 = vtanh.f32 %v1686_v38 }
0x1711   :  { %v2436_v39 = vpop.eup %2435 }
0x1712   :  { %v1689_v41 = vadd.f32 1.0, %v2436_v39 }
0x1713   :  { %v2438_v43 = vpop.eup %2437 }
0x1714   :  { %v1690_v49 = vadd.f32 1.0, %v2438_v43  ;;  %v1691_v34 = vmul.f32 %v1689_v41, %v1675_v45  ;;  %v2078_v43 = vld [vmem:[%s3012_s16] ss:$0 sm:$0xff] }
0x1716   :  { %v1692_v28 = vmul.f32 %v1690_v49, %v1676_v48 }
0x1718   :  { %v1702_v50 = vpack.c.bf16 %v1692_v28, %v1691_v34 }
0x171a   :  { %2313 = vmatmul.mubr.msk.bf16.vlgmr.msra.gmra.mrb[48].mxu0 %vm879_vm5, %v1702_v50 }
0x17ed   :  { %v1772_v40 = vpop.f32.mrb[48].mxu0 }
0x17ee   :  { %v1773_v35 = vadd.f32 %v2067_v51, %v1772_v40  ;;  %v2314_v52 = vpop.f32.mrb[49].mxu0 }
0x17ef   :  { %v1775_v54 = vpop.f32.mrb[50].mxu0 }
0x17f0   :  { %v1776_v55 = vadd.f32 %v2067_v51, %v1775_v54  ;;  %v2315_v56 = vpop.f32.mrb[51].mxu0  ;;  %v1779_v57 = vadd.f32 %v1773_v35, %v1603_v8 }
0x17f2   :  { %v1783_v59 = vsel %vm61_vm0, %v1779_v57, 0.0  ;;  %v1780_v60 = vadd.f32 %v1776_v55, %v1604_v9  ;;  %v2073_v9 = vld [vmem:[%s3008_s12 + $0x2] sm:$0x3] }
0x17f3   :  { %1784 = vadd.xlane.f32.xlu1 %v1783_v59  ;;  %v1812_v10 = vrot.slane %v2073_v9, %v2593_v25  ;;  %v1818_v13 = vrot.slane %v2073_v9, %v2599_v30  ;;  %v1894_v25 = vld [vmem:[%s3011_s15] sm:$0xff]  ;;  %v1895_v30 = vld [vmem:[%s3011_s15 + $0x8] sm:$0xff]  ;;  %s2478_s15 = smov [#allocation2]  }
0x17f4   :  { %v1786_v29 = vsel %vm61_vm0, %v1780_v60, 0.0  ;;  %v2336_v23 = vpack.c.bf16 %v1895_v30, %v1894_v25  ;;  %s1986_s22 = sshll.u32 %s2478_s15, 4  ;;  %s1987_s22 = int_to_ptr.vmem [resolvable:$true] %s1986_s22 }
0x17f5   :  { %1787 = vadd.xlane.f32.xlu0 %v1786_v29  ;;  %s2445_s14 = scalar_lea.vmem %s1987_s22, 32  ;;  %p2450_p1 = scmp.lt.s32.totalorder %s1987_s22, %s1987_s22 }
0x17f6   :  { %p2446_p0 = scmp.ne.s32.totalorder %s1987_s22, %s2445_s14  ;;  %p2451_p2 = scmp.lt.s32.totalorder %s2445_s14, %s2445_s14 }
0x17f8   :  { %p2452_p3 = por %p2451_p2, %p2450_p1 }
0x17fa   :  { %p2453_p4 = pnand %p2452_p3, %p2446_p0 }
0x1880   :  { %v1785_v31 = vpop.xlane.xlu1 %1784 }
0x1881   :  { %v1789_v61 = vmul.f32 0.03125, %v1785_v31 }
0x1882   :  { %v1788_v62 = vpop.xlane.xlu0 %1787 }
0x1883   :  { %v1791_v63 = vsub.f32 %v1779_v57, %v1789_v61  ;;  %v1790_v0 = vmul.f32 0.03125, %v1788_v62 }
0x1885   :  { %v1792_v36 = vsub.f32 %v1780_v60, %v1790_v0  ;;  %v1793_v37 = vmul.f32 %v1791_v63, %v1791_v63 }
0x1887   :  { %v1795_v53 = vsel %vm61_vm0, %v1793_v37, 0.0  ;;  %v1794_v1 = vmul.f32 %v1792_v36, %v1792_v36 }
0x1888   :  { %1796 = vadd.xlane.f32.xlu1 %v1795_v53 }
0x1889   :  { %v1798_v58 = vsel %vm61_vm0, %v1794_v1, 0.0 }
0x188a   :  { %1799 = vadd.xlane.f32.xlu0 %v1798_v58 }
0x1915   :  { %v1797_v42 = vpop.xlane.xlu1 %1796 }
0x1916   :  { %v1801_v4 = vmul.f32 0.03125, %v1797_v42 }
0x1917   :  { %v1800_v5 = vpop.xlane.xlu0 %1799 }
0x1918   :  { %v1803_v6 = vadd.f32 1e-12, %v1801_v4  ;;  %v1802_v7 = vmul.f32 0.03125, %v1800_v5 }
0x191a   :  { %2439 = vrsqrt.f32 %v1803_v6  ;;  %v1804_v8 = vadd.f32 1e-12, %v1802_v7 }
0x191c   :  { %2441 = vrsqrt.f32 %v1804_v8 }
0x1924   :  { %v2440_v47 = vpop.eup %2439 }
0x1925   :  { %v1807_v11 = vmul.f32 %v2440_v47, %v1791_v63 }
0x1926   :  { %v2442_v46 = vpop.eup %2441 }
0x1927   :  { %v1808_v12 = vmul.f32 %v2442_v46, %v1792_v36  ;;  %v1813_v14 = vmul.f32 %v1812_v10, %v1807_v11 }
0x1929   :  { %v1814_v16 = vmul.f32 %v1812_v10, %v1808_v12  ;;  %v1819_v18 = vadd.f32 %v1818_v13, %v1813_v14 }
0x192b   :  { %v1820_v17 = vadd.f32 %v1818_v13, %v1814_v16 }
0x192d   :  { %v1822_v19 = vrot.slane %v1820_v17, 7 }
0x192f   :  { %v1825_v44 = vsel %vm1824_vm6, %v1819_v18, %v1822_v19 }
0x1930   :  { %v1830_v20 = vpack.c.bf16 %v1825_v44, %v1825_v44 }
0x1932   :  { %2321 = vmatmul.mubr.msk.bf16.vlgmr.msra.gmra.mrb[44].mxu1 %vm61_vm0, %v1830_v20 }
0x1933   :  { %2332 = vmatprep.mubr.msk.f32.mxu1 %vm2470_vm1, %v2469_v15  ;;  %2337 = vmatpush3.bf16.msra.mxu1 %v2336_v23  ;;  %v2339_v15 = vpack.c.bf16 %v1897_v24, %v1896_v21 }
0x1934   :  { %2338 = vmatprep.subr.bf16.mxu1 %v2477_v22 }
0x1937   :  { %2340 = vmatpush3.bf16.msra.mxu1 %v2339_v15 }
0x1a05   :  { %v1887_v27 = vpop.f32.mrb[44].mxu1 }
0x1a06   :  { %v1888_v32 = vadd.f32 %v2074_v26, %v1887_v27  ;;  %v2322_v33 = vpop.f32.mrb[45].mxu1 }
0x1a07   :  { %v1890_v38 = vpop.f32.mrb[46].mxu1 }
0x1a08   :  { %2443 = vtanh.f32 %v1888_v32  ;;  %v2323_v39 = vpop.f32.mrb[47].mxu1 }
0x1a12   :  { %v2444_v41 = vpop.eup %2443 }
0x1a13   :  { %2333 = vmatmul.mubr.msk.f32.vlgmr.msra.gmra.mrb[48].mxu1 %vm61_vm0, %v2444_v41 }
0x1ae6   :  { %v1974_v45 = vpop.f32.mrb[48].mxu1 }
0x1ae7   :  { %v1975_v48 = vadd.f32 %v2078_v43, %v1974_v45  ;;  %v2334_v49 = vpop.f32.mrb[49].mxu1 }
0x1ae9   :  { %1979 = vst.msk [vmem:[#allocation2] sm:$0x3] %vm1978_vm7, %v1975_v48 }
0x1aea   :  { %2456 = shalt.err (!%p2453_p4)
}
0x1aeb   :  { %s2457_s25 = scalar_lea.hbm %s3013_s17, 32 }
0x1aec   :  { %p2458_p5 = scmp.ne.s32.totalorder %s3013_s17, %s2457_s25  ;;  %p2461_p6 = scmp.lt.u32.totalorder %s2457_s25, %s3013_s17 }
0x1aee   :  { %p2463_p7 = pnand %p2461_p6, %p2458_p5 }
0x1af0   :  { %2466 = shalt.err (!%p2463_p7)
}
0x1af1   :  { %1989 = dma.vmem_to_hbm [thread:$0]  %s1987_s22, 32, %s3013_s17, [#allocation3]  }
0x1af2   :  { %2467 = dma.done.wait [#allocation3], 32  }
0x1af3   :  { %2468 = vsyncadd [#allocation3], 4294967264 }
0x1af4   :  { %1993 = vsyncpa [#allocation3], 1 }

</bundles_post_ra>
